<compile_context>
chip_gen: v5e
topology: v5e:2x2
jax: 0.10.0
libtpu: 0.0.40
codegen_flags: <defaults>
</compile_context>

<pallas_src>
import functools

import jax
import jax.numpy as jnp
from jax.experimental import pallas as pl
from jax.experimental.pallas import tpu as pltpu

LN_EPS = 1e-5  # PyTorch nn.LayerNorm default


def _patch_merge_kernel(xe_ref, xo_ref, w_ref, a_ref, cb_ref, o_ref, *, d_dim):
    """Fused parity-gather + LayerNorm(8C) + Linear(8C -> 2C, bias=False).

    xe_ref: (TH, 2, W2, 2C)   d-even slices   (h-parity, w2, w-parity*C)
    xo_ref: (TH, 2, W2, 2C)   d-odd  slices   (index_map clamped; masked if D odd)
    w_ref : (4, 2C, Cout)     per-(d,h)-parity weights (LN gamma folded in)
    a_ref : (4, 1, 2C)        channel multiplicities for the 8C mean/var
    cb_ref: (2, 1, Cout)      [column sums of W', beta @ W.T]
    o_ref : (TH*W2, Cout)
    """
    f32 = jnp.float32
    th, _, w2, c2 = xe_ref.shape
    rows = th * w2
    inv_8c = 1.0 / (4.0 * c2)                      # 8C == 4 * 2C

    # Slab extraction: integer-index the h-parity dim, then collapse the two
    # leading dims.  The minor dim (2C) is unchanged -> layout-free reshape.
    s00 = xe_ref[:, 0, :, :].reshape(rows, c2)     # (d even, h even)
    s01 = xe_ref[:, 1, :, :].reshape(rows, c2)     # (d even, h odd )
    s10 = xo_ref[:, 0, :, :].reshape(rows, c2)     # (d odd , h even)
    s11 = xo_ref[:, 1, :, :].reshape(rows, c2)     # (d odd , h odd )

    if d_dim % 2:
        # Odd D: the last d-pair has no odd slice.  Its index_map was clamped to
        # D-1, so zero the slab here (reproduces the module's zero padding and
        # replaces the jnp.pad HBM round-trip of the previous version).
        keep = ((2 * pl.program_id(1) + 1) < d_dim).astype(s10.dtype)
        s10 = s10 * keep
        s11 = s11 * keep

    # One-pass LayerNorm statistics in f32 (no centered-slab temporaries).
    a = a_ref[...]                                 # (4, 1, 2C) f32 multiplicities

    def _acc(s, mult):
        xf = s.astype(f32)
        ax = xf * mult
        return (jnp.sum(ax, -1, keepdims=True),
                jnp.sum(ax * xf, -1, keepdims=True))

    m0, q0 = _acc(s00, a[0])
    m1, q1 = _acc(s10, a[1])
    m2, q2 = _acc(s01, a[2])
    m3, q3 = _acc(s11, a[3])
    mean = (m0 + m1 + m2 + m3) * inv_8c
    var = jnp.maximum((q0 + q1 + q2 + q3) * inv_8c - mean * mean, 0.0)
    inv_std = jax.lax.rsqrt(var + LN_EPS)

    # x_merged @ (gamma * W.T) decomposed per parity slab (duplicated channel
    # groups were pre-summed into w_ref); raw slabs feed the MXU directly and
    # the normalization is applied to the f32 result.
    w = w_ref[...]                                 # (4, 2C, Cout), MXU dtype
    md = w.dtype
    z = (jnp.dot(s00.astype(md), w[0], preferred_element_type=f32)
         + jnp.dot(s10.astype(md), w[1], preferred_element_type=f32)
         + jnp.dot(s01.astype(md), w[2], preferred_element_type=f32)
         + jnp.dot(s11.astype(md), w[3], preferred_element_type=f32))

    cb = cb_ref[...]                               # (2, 1, Cout) f32
    o_ref[...] = (inv_std * (z - mean * cb[0]) + cb[1]).astype(o_ref.dtype)


def _round_up(v, m):
    return -(-v // m) * m


def _tiled_bytes(rows, cols, dtype, lead=1):
    """VMEM bytes of a (lead..., rows, cols) buffer in the native tiled layout
    (minor dim padded to 128 lanes, second-minor to the dtype's sublane pack)."""
    it = jnp.dtype(dtype).itemsize
    sub = max(8, 32 // max(it, 1))                 # 8 f32, 16 bf16, 32 int8
    return lead * _round_up(max(rows, 1), sub) * _round_up(max(cols, 1), 128) * it


def _pick_block_rows(h2, w2, c2, cout, in_dt, out_dt, w_dt, budget):
    """Largest H2 tile whose double-buffered blocks + f32 temporaries fit the
    planning budget, accounting for (8,128) padding.  Prefers th | H2."""
    f32 = jnp.float32
    # Grid-constant (but still double-buffered) buffers.
    fixed = 2 * (_tiled_bytes(c2, cout, w_dt, lead=4)      # packed weights
                 + _tiled_bytes(1, c2, f32, lead=4)        # channel multiplicities
                 + _tiled_bytes(1, cout, f32, lead=2))     # col-sum / folded bias

    def need(th):
        rows = th * w2
        return (fixed
                + 2 * 2 * _tiled_bytes(w2, c2, in_dt, lead=2 * th)  # xe+xo, 2-buffered
                + 2 * _tiled_bytes(rows, cout, out_dt)              # out, 2-buffered
                + 2 * _tiled_bytes(rows, c2, f32)                   # f32 stat temps
                + 2 * _tiled_bytes(rows, cout, f32))                # f32 matmul/out temps

    # Output block (th*W2, Cout): second-minor must be a multiple of 8 unless it
    # spans the full row extent.
    valid = [th for th in range(1, h2 + 1) if th == h2 or (th * w2) % 8 == 0]
    fitting = [th for th in valid if need(th) <= budget]
    if not fitting:
        # TODO(synk): tile Cout with an innermost grid axis when the packed weight
        # alone exceeds the budget (very large C on v7x).
        return min(valid)
    best = max(fitting)
    divisors = [th for th in fitting if h2 % th == 0]
    if divisors and 2 * max(divisors) >= best:
        return max(divisors)                        # even split: no ragged last tile
    return best


def _vmem_budgets():
    """(vmem_limit_bytes, planning budget) — generation aware."""
    mib = 1 << 20
    cap = 0
    try:
        cap = int(getattr(pltpu.get_tpu_info(), "vmem_capacity_bytes", 0) or 0)
    except Exception:
        cap = 0
    if cap >= 100 * mib:                            # v5e / v6e: 128 MiB physical VMEM
        return 64 * mib, 44 * mib
    return 32 * mib, 22 * mib                       # v7x (64 MiB) or unknown


def patch_merging_forward(x, gamma, beta, weight, *, mxu_dtype=None,
                          block_rows=None):
    """JAX/Pallas equivalent of PatchMerging.forward.

    x:      (B, D, H, W, C)   (f32 or bf16; output follows x.dtype)
    gamma:  (8C,)   LayerNorm scale
    beta:   (8C,)   LayerNorm bias
    weight: (2C, 8C)  nn.Linear weight (bias=False)
    returns (B, ceil(D/2), ceil(H/2), ceil(W/2), 2C)
    """
    B, D, H, W, C = x.shape
    cout = weight.shape[0]
    assert weight.shape == (2 * C, 8 * C), weight.shape
    assert gamma.shape == (8 * C,) and beta.shape == (8 * C,)
    f32 = jnp.float32

    # Odd D is handled inside the kernel (clamped index_map + masking) so the
    # common odd-depth case pays no jnp.pad HBM round-trip.
    # TODO(synk): also fuse odd-H / odd-W padding into the kernel.
    pad_h, pad_w = H % 2, W % 2
    if pad_h or pad_w:
        x = jnp.pad(x, ((0, 0), (0, 0), (0, pad_h), (0, pad_w), (0, 0)))
    H2, W2 = (H + pad_h) // 2, (W + pad_w) // 2
    D2 = (D + 1) // 2
    c2 = 2 * C

    # Free row-major HBM view: (B, D, H2, h-parity, W2, w-parity*C).
    x6 = x.reshape(B, D, H2, 2, W2, c2)

    # MXU / packed-weight dtype: bf16 when the input is bf16 or the (4,2C,2C)
    # packed weight gets large; LN stats and matmul accumulation stay f32.
    if mxu_dtype is None:
        mxu_dtype = jnp.bfloat16 if (x.dtype == jnp.bfloat16 or C >= 192) else f32

    # Fold the LN affine into the reduction weight: W' = gamma[:, None] * W.T.
    wp = gamma.astype(f32)[:, None] * weight.astype(f32).T        # (8C, Cout)
    blk = [wp[k * C:(k + 1) * C] for k in range(8)]
    zeros = jnp.zeros_like(blk[0])
    # Module concatenates [x0..x7] with x5 == x2 and x6 == x3; fold the
    # duplicated groups into the weights of the slab that carries them.
    w_pack = jnp.stack([
        jnp.concatenate([blk[0], blk[3] + blk[6]], axis=0),   # (d=0, h=0) slab
        jnp.concatenate([blk[1], blk[4]], axis=0),            # (d=1, h=0) slab
        jnp.concatenate([blk[2] + blk[5], zeros], axis=0),    # (d=0, h=1) slab
        jnp.concatenate([zeros, blk[7]], axis=0),             # (d=1, h=1) slab
    ]).astype(mxu_dtype)                                      # (4, 2C, Cout)

    ones_c, zeros_c = jnp.ones((C,), f32), jnp.zeros((C,), f32)
    a_pack = jnp.stack([
        jnp.concatenate([ones_c, 2.0 * ones_c]),              # (0,0): w-odd counted twice
        jnp.concatenate([ones_c, ones_c]),                    # (1,0)
        jnp.concatenate([2.0 * ones_c, zeros_c]),             # (0,1): w-even counted twice
        jnp.concatenate([zeros_c, ones_c]),                   # (1,1): only w-odd used
    ]).reshape(4, 1, c2)

    col_sum = jnp.sum(wp, axis=0).reshape(1, cout)            # ones(8C) @ W'
    bias = jnp.dot(beta.astype(f32), weight.astype(f32).T,
                   precision=jax.lax.Precision.HIGHEST).reshape(1, cout)
    cb = jnp.stack([col_sum, bias])                           # (2, 1, Cout)

    vmem_limit, plan_budget = _vmem_budgets()
    if block_rows is None:
        th = _pick_block_rows(H2, W2, c2, cout, x.dtype, x.dtype, mxu_dtype,
                              plan_budget)
    else:
        th = max(1, min(int(block_rows), H2))
        while th > 1 and th != H2 and (th * W2) % 8 != 0:
            th -= 1
        if th != H2 and (th * W2) % 8 != 0:
            th = H2
    th = max(1, min(int(th), H2))
    grid = (B, D2, pl.cdiv(H2, th))
    d_last = D - 1

    out = pl.pallas_call(
        functools.partial(_patch_merge_kernel, d_dim=D),
        out_shape=jax.ShapeDtypeStruct((B, D2, H2 * W2, cout), x.dtype),
        grid_spec=pltpu.PrefetchScalarGridSpec(
            num_scalar_prefetch=0,
            grid=grid,
            in_specs=[
                # d-even slices.
                pl.BlockSpec((None, None, th, 2, W2, c2),
                             lambda b, j, t: (b, 2 * j, t, 0, 0, 0)),
                # d-odd slices (clamped for the odd-D remainder; masked in-kernel).
                pl.BlockSpec((None, None, th, 2, W2, c2),
                             lambda b, j, t: (b, jnp.minimum(2 * j + 1, d_last),
                                              t, 0, 0, 0)),
                pl.BlockSpec((4, c2, cout), lambda b, j, t: (0, 0, 0)),
                pl.BlockSpec((4, 1, c2), lambda b, j, t: (0, 0, 0)),
                pl.BlockSpec((2, 1, cout), lambda b, j, t: (0, 0, 0)),
            ],
            out_specs=pl.BlockSpec((None, None, th * W2, cout),
                                   lambda b, j, t: (b, j, t, 0)),
        ),
        compiler_params=pltpu.CompilerParams(
            dimension_semantics=("parallel", "parallel", "parallel"),
            vmem_limit_bytes=vmem_limit,
        ),
    )(x6, x6, w_pack, a_pack, cb)

    return out.reshape(B, D2, H2, W2, cout)


def _reference_forward(x, gamma, beta, weight):
    """Pure-JAX reference mirroring the PyTorch module exactly."""
    B, D, H, W, C = x.shape
    if D % 2 or H % 2 or W % 2:
        x = jnp.pad(x, ((0, 0), (0, D % 2), (0, H % 2), (0, W % 2), (0, 0)))
    x0 = x[:, 0::2, 0::2, 0::2, :]
    x1 = x[:, 1::2, 0::2, 0::2, :]
    x2 = x[:, 0::2, 1::2, 0::2, :]
    x3 = x[:, 0::2, 0::2, 1::2, :]
    x4 = x[:, 1::2, 0::2, 1::2, :]
    x5 = x[:, 0::2, 1::2, 0::2, :]
    x6 = x[:, 0::2, 0::2, 1::2, :]
    x7 = x[:, 1::2, 1::2, 1::2, :]
    xm = jnp.concatenate([x0, x1, x2, x3, x4, x5, x6, x7], axis=-1)
    mean = jnp.mean(xm, axis=-1, keepdims=True)
    var = jnp.mean((xm - mean) ** 2, axis=-1, keepdims=True)
    y = (xm - mean) * jax.lax.rsqrt(var + LN_EPS) * gamma + beta
    return jnp.einsum("...k,ok->...o", y, weight,
                      precision=jax.lax.Precision.HIGHEST)


if __name__ == "__main__":
    feature_size = 4                                    # C
    B, D, H, W, C = 2, 5, 16, 16, feature_size          # odd D exercises the in-kernel remainder path

    key = jax.random.PRNGKey(0)
    kx, kw, kg, kb = jax.random.split(key, 4)
    x = jax.random.normal(kx, (B, D, H, W, C), dtype=jnp.float32)
    gamma = 1.0 + 0.1 * jax.random.normal(kg, (8 * C,), dtype=jnp.float32)
    beta = 0.1 * jax.random.normal(kb, (8 * C,), dtype=jnp.float32)
    weight = 0.02 * jax.random.normal(kw, (2 * C, 8 * C), dtype=jnp.float32)

    ref = _reference_forward(x, gamma, beta, weight)

    # f32 path.
    out = jax.block_until_ready(patch_merging_forward(x, gamma, beta, weight))
    assert out.shape == (B, (D + 1) // 2, H // 2, W // 2, 2 * C), out.shape
    err = float(jnp.max(jnp.abs(out - ref)))
    assert jnp.allclose(out, ref, atol=1e-3, rtol=1e-3), err

    # bf16 HBM I/O + bf16 MXU path (loose check).
    out_bf16 = jax.block_until_ready(
        patch_merging_forward(x.astype(jnp.bfloat16), gamma, beta, weight,
                              mxu_dtype=jnp.bfloat16))
    assert out_bf16.dtype == jnp.bfloat16
    err16 = float(jnp.max(jnp.abs(out_bf16.astype(jnp.float32) - ref)))
    assert jnp.allclose(out_bf16.astype(jnp.float32), ref,
                        atol=5e-2, rtol=5e-2), err16

    print("KERNEL_OK")
</pallas_src>

<mosaic_0001>
module attributes {stable_mosaic.version = 11 : i64} {
  func.func @_patch_merge_kernel(%arg0: i32, %arg1: i32, %arg2: i32, %arg3: memref<1x1x8x2x8x8xf32, #tpu.memory_space<vmem>>, %arg4: memref<1x1x8x2x8x8xf32, #tpu.memory_space<vmem>>, %arg5: memref<4x8x8xf32, #tpu.memory_space<vmem>>, %arg6: memref<4x1x8xf32, #tpu.memory_space<vmem>>, %arg7: memref<2x1x8xf32, #tpu.memory_space<vmem>>, %arg8: memref<1x1x64x8xf32, #tpu.memory_space<vmem>>) attributes {dimension_semantics = [#tpu.dimension_semantics<parallel>, #tpu.dimension_semantics<parallel>, #tpu.dimension_semantics<parallel>], iteration_bounds = array<i64: 2, 3, 1>, scalar_prefetch = 0 : i64, scratch_operands = 0 : i64, tpu.core_type = #tpu.core_type<tc>, window_params = [{transform_indices = @transform_0, window_bounds = array<i64: 1, 1, 8, 2, 8, 8>}, {transform_indices = @transform_1, window_bounds = array<i64: 1, 1, 8, 2, 8, 8>}, {pipeline_mode = #tpu.pipeline_mode<synchronous>, transform_indices = @transform_2, window_bounds = array<i64: 4, 8, 8>}, {pipeline_mode = #tpu.pipeline_mode<synchronous>, transform_indices = @transform_3, window_bounds = array<i64: 4, 1, 8>}, {pipeline_mode = #tpu.pipeline_mode<synchronous>, transform_indices = @transform_4, window_bounds = array<i64: 2, 1, 8>}, {transform_indices = @transform_5, window_bounds = array<i64: 1, 1, 64, 8>}]} {
    %c0 = arith.constant 0 : index
    %c0_0 = arith.constant 0 : index
    %c0_1 = arith.constant 0 : index
    %c0_2 = arith.constant 0 : index
    %c0_3 = arith.constant 0 : index
    %c0_4 = arith.constant 0 : index
    %0 = vector.load %arg3[%c0, %c0_0, %c0_1, %c0_2, %c0_3, %c0_4] : memref<1x1x8x2x8x8xf32, #tpu.memory_space<vmem>>, vector<1x1x8x1x8x8xf32>
    %1 = vector.shape_cast %0 : vector<1x1x8x1x8x8xf32> to vector<8x8x8xf32>
    %2 = vector.shape_cast %1 : vector<8x8x8xf32> to vector<64x8xf32>
    %c0_5 = arith.constant 0 : index
    %c0_6 = arith.constant 0 : index
    %c0_7 = arith.constant 0 : index
    %c1 = arith.constant 1 : index
    %c0_8 = arith.constant 0 : index
    %c0_9 = arith.constant 0 : index
    %3 = vector.load %arg3[%c0_5, %c0_6, %c0_7, %c1, %c0_8, %c0_9] : memref<1x1x8x2x8x8xf32, #tpu.memory_space<vmem>>, vector<1x1x8x1x8x8xf32>
    %4 = vector.shape_cast %3 : vector<1x1x8x1x8x8xf32> to vector<8x8x8xf32>
    %5 = vector.shape_cast %4 : vector<8x8x8xf32> to vector<64x8xf32>
    %c0_10 = arith.constant 0 : index
    %c0_11 = arith.constant 0 : index
    %c0_12 = arith.constant 0 : index
    %c0_13 = arith.constant 0 : index
    %c0_14 = arith.constant 0 : index
    %c0_15 = arith.constant 0 : index
    %6 = vector.load %arg4[%c0_10, %c0_11, %c0_12, %c0_13, %c0_14, %c0_15] : memref<1x1x8x2x8x8xf32, #tpu.memory_space<vmem>>, vector<1x1x8x1x8x8xf32>
    %7 = vector.shape_cast %6 : vector<1x1x8x1x8x8xf32> to vector<8x8x8xf32>
    %8 = vector.shape_cast %7 : vector<8x8x8xf32> to vector<64x8xf32>
    %c0_16 = arith.constant 0 : index
    %c0_17 = arith.constant 0 : index
    %c0_18 = arith.constant 0 : index
    %c1_19 = arith.constant 1 : index
    %c0_20 = arith.constant 0 : index
    %c0_21 = arith.constant 0 : index
    %9 = vector.load %arg4[%c0_16, %c0_17, %c0_18, %c1_19, %c0_20, %c0_21] : memref<1x1x8x2x8x8xf32, #tpu.memory_space<vmem>>, vector<1x1x8x1x8x8xf32>
    %10 = vector.shape_cast %9 : vector<1x1x8x1x8x8xf32> to vector<8x8x8xf32>
    %11 = vector.shape_cast %10 : vector<8x8x8xf32> to vector<64x8xf32>
    %c2_i32 = arith.constant 2 : i32
    %12 = arith.muli %c2_i32, %arg1 : i32
    %c1_i32 = arith.constant 1 : i32
    %13 = arith.addi %12, %c1_i32 : i32
    %c5_i32 = arith.constant 5 : i32
    %14 = arith.cmpi slt, %13, %c5_i32 : i32
    %15 = arith.extui %14 : i1 to i32
    %16 = arith.sitofp %15 : i32 to f32
    %17 = vector.broadcast %16 : f32 to vector<64x8xf32>
    %18 = arith.mulf %8, %17 : vector<64x8xf32>
    %19 = vector.broadcast %16 : f32 to vector<64x8xf32>
    %20 = arith.mulf %11, %19 : vector<64x8xf32>
    %c0_22 = arith.constant 0 : index
    %c0_23 = arith.constant 0 : index
    %c0_24 = arith.constant 0 : index
    %21 = vector.load %arg6[%c0_22, %c0_23, %c0_24] : memref<4x1x8xf32, #tpu.memory_space<vmem>>, vector<4x1x8xf32>
    %22 = vector.extract_strided_slice %21 {offsets = [0, 0, 0], sizes = [1, 1, 8], strides = [1, 1, 1]} : vector<4x1x8xf32> to vector<1x1x8xf32>
    %23 = vector.shape_cast %22 : vector<1x1x8xf32> to vector<1x8xf32>
    %24 = vector.broadcast %23 : vector<1x8xf32> to vector<64x8xf32>
    %25 = arith.mulf %2, %24 : vector<64x8xf32>
    %cst = arith.constant dense<0.000000e+00> : vector<64xf32>
    %26 = vector.multi_reduction <add>, %25, %cst [1] : vector<64x8xf32> to vector<64xf32>
    %27 = vector.shape_cast %26 : vector<64xf32> to vector<64x1xf32>
    %28 = arith.mulf %25, %2 : vector<64x8xf32>
    %cst_25 = arith.constant dense<0.000000e+00> : vector<64xf32>
    %29 = vector.multi_reduction <add>, %28, %cst_25 [1] : vector<64x8xf32> to vector<64xf32>
    %30 = vector.shape_cast %29 : vector<64xf32> to vector<64x1xf32>
    %31 = vector.extract_strided_slice %21 {offsets = [1, 0, 0], sizes = [1, 1, 8], strides = [1, 1, 1]} : vector<4x1x8xf32> to vector<1x1x8xf32>
    %32 = vector.shape_cast %31 : vector<1x1x8xf32> to vector<1x8xf32>
    %33 = vector.broadcast %32 : vector<1x8xf32> to vector<64x8xf32>
    %34 = arith.mulf %18, %33 : vector<64x8xf32>
    %cst_26 = arith.constant dense<0.000000e+00> : vector<64xf32>
    %35 = vector.multi_reduction <add>, %34, %cst_26 [1] : vector<64x8xf32> to vector<64xf32>
    %36 = vector.shape_cast %35 : vector<64xf32> to vector<64x1xf32>
    %37 = arith.mulf %34, %18 : vector<64x8xf32>
    %cst_27 = arith.constant dense<0.000000e+00> : vector<64xf32>
    %38 = vector.multi_reduction <add>, %37, %cst_27 [1] : vector<64x8xf32> to vector<64xf32>
    %39 = vector.shape_cast %38 : vector<64xf32> to vector<64x1xf32>
    %40 = vector.extract_strided_slice %21 {offsets = [2, 0, 0], sizes = [1, 1, 8], strides = [1, 1, 1]} : vector<4x1x8xf32> to vector<1x1x8xf32>
    %41 = vector.shape_cast %40 : vector<1x1x8xf32> to vector<1x8xf32>
    %42 = vector.broadcast %41 : vector<1x8xf32> to vector<64x8xf32>
    %43 = arith.mulf %5, %42 : vector<64x8xf32>
    %cst_28 = arith.constant dense<0.000000e+00> : vector<64xf32>
    %44 = vector.multi_reduction <add>, %43, %cst_28 [1] : vector<64x8xf32> to vector<64xf32>
    %45 = vector.shape_cast %44 : vector<64xf32> to vector<64x1xf32>
    %46 = arith.mulf %43, %5 : vector<64x8xf32>
    %cst_29 = arith.constant dense<0.000000e+00> : vector<64xf32>
    %47 = vector.multi_reduction <add>, %46, %cst_29 [1] : vector<64x8xf32> to vector<64xf32>
    %48 = vector.shape_cast %47 : vector<64xf32> to vector<64x1xf32>
    %49 = vector.extract_strided_slice %21 {offsets = [3, 0, 0], sizes = [1, 1, 8], strides = [1, 1, 1]} : vector<4x1x8xf32> to vector<1x1x8xf32>
    %50 = vector.shape_cast %49 : vector<1x1x8xf32> to vector<1x8xf32>
    %51 = vector.broadcast %50 : vector<1x8xf32> to vector<64x8xf32>
    %52 = arith.mulf %20, %51 : vector<64x8xf32>
    %cst_30 = arith.constant dense<0.000000e+00> : vector<64xf32>
    %53 = vector.multi_reduction <add>, %52, %cst_30 [1] : vector<64x8xf32> to vector<64xf32>
    %54 = vector.shape_cast %53 : vector<64xf32> to vector<64x1xf32>
    %55 = arith.mulf %52, %20 : vector<64x8xf32>
    %cst_31 = arith.constant dense<0.000000e+00> : vector<64xf32>
    %56 = vector.multi_reduction <add>, %55, %cst_31 [1] : vector<64x8xf32> to vector<64xf32>
    %57 = vector.shape_cast %56 : vector<64xf32> to vector<64x1xf32>
    %58 = arith.addf %27, %36 : vector<64x1xf32>
    %59 = arith.addf %58, %45 : vector<64x1xf32>
    %60 = arith.addf %59, %54 : vector<64x1xf32>
    %cst_32 = arith.constant 3.125000e-02 : f32
    %61 = vector.broadcast %cst_32 : f32 to vector<64x1xf32>
    %62 = arith.mulf %60, %61 : vector<64x1xf32>
    %63 = arith.addf %30, %39 : vector<64x1xf32>
    %64 = arith.addf %63, %48 : vector<64x1xf32>
    %65 = arith.addf %64, %57 : vector<64x1xf32>
    %cst_33 = arith.constant 3.125000e-02 : f32
    %66 = vector.broadcast %cst_33 : f32 to vector<64x1xf32>
    %67 = arith.mulf %65, %66 : vector<64x1xf32>
    %68 = arith.mulf %62, %62 : vector<64x1xf32>
    %69 = arith.subf %67, %68 : vector<64x1xf32>
    %cst_34 = arith.constant 0.000000e+00 : f32
    %70 = vector.broadcast %cst_34 : f32 to vector<64x1xf32>
    %71 = arith.maximumf %69, %70 : vector<64x1xf32>
    %cst_35 = arith.constant 9.99999974E-6 : f32
    %72 = vector.broadcast %cst_35 : f32 to vector<64x1xf32>
    %73 = arith.addf %71, %72 : vector<64x1xf32>
    %74 = math.rsqrt %73 : vector<64x1xf32>
    %c0_36 = arith.constant 0 : index
    %c0_37 = arith.constant 0 : index
    %c0_38 = arith.constant 0 : index
    %75 = vector.load %arg5[%c0_36, %c0_37, %c0_38] : memref<4x8x8xf32, #tpu.memory_space<vmem>>, vector<4x8x8xf32>
    %76 = vector.extract_strided_slice %75 {offsets = [0, 0, 0], sizes = [1, 8, 8], strides = [1, 1, 1]} : vector<4x8x8xf32> to vector<1x8x8xf32>
    %77 = vector.shape_cast %76 : vector<1x8x8xf32> to vector<8x8xf32>
    %cst_39 = arith.constant dense<0.000000e+00> : vector<64x8xf32>
    %78 = tpu.matmul %2, %77, %cst_39 {dimension_numbers = #tpu.dot_dimension_numbers<[1], [0], [0], [1], [0, 0, 1, 1], [], []>} : vector<64x8xf32>, vector<8x8xf32>, vector<64x8xf32> -> vector<64x8xf32>
    %79 = vector.extract_strided_slice %75 {offsets = [1, 0, 0], sizes = [1, 8, 8], strides = [1, 1, 1]} : vector<4x8x8xf32> to vector<1x8x8xf32>
    %80 = vector.shape_cast %79 : vector<1x8x8xf32> to vector<8x8xf32>
    %cst_40 = arith.constant dense<0.000000e+00> : vector<64x8xf32>
    %81 = tpu.matmul %18, %80, %cst_40 {dimension_numbers = #tpu.dot_dimension_numbers<[1], [0], [0], [1], [0, 0, 1, 1], [], []>} : vector<64x8xf32>, vector<8x8xf32>, vector<64x8xf32> -> vector<64x8xf32>
    %82 = arith.addf %78, %81 : vector<64x8xf32>
    %83 = vector.extract_strided_slice %75 {offsets = [2, 0, 0], sizes = [1, 8, 8], strides = [1, 1, 1]} : vector<4x8x8xf32> to vector<1x8x8xf32>
    %84 = vector.shape_cast %83 : vector<1x8x8xf32> to vector<8x8xf32>
    %cst_41 = arith.constant dense<0.000000e+00> : vector<64x8xf32>
    %85 = tpu.matmul %5, %84, %cst_41 {dimension_numbers = #tpu.dot_dimension_numbers<[1], [0], [0], [1], [0, 0, 1, 1], [], []>} : vector<64x8xf32>, vector<8x8xf32>, vector<64x8xf32> -> vector<64x8xf32>
    %86 = arith.addf %82, %85 : vector<64x8xf32>
    %87 = vector.extract_strided_slice %75 {offsets = [3, 0, 0], sizes = [1, 8, 8], strides = [1, 1, 1]} : vector<4x8x8xf32> to vector<1x8x8xf32>
    %88 = vector.shape_cast %87 : vector<1x8x8xf32> to vector<8x8xf32>
    %cst_42 = arith.constant dense<0.000000e+00> : vector<64x8xf32>
    %89 = tpu.matmul %20, %88, %cst_42 {dimension_numbers = #tpu.dot_dimension_numbers<[1], [0], [0], [1], [0, 0, 1, 1], [], []>} : vector<64x8xf32>, vector<8x8xf32>, vector<64x8xf32> -> vector<64x8xf32>
    %90 = arith.addf %86, %89 : vector<64x8xf32>
    %c0_43 = arith.constant 0 : index
    %c0_44 = arith.constant 0 : index
    %c0_45 = arith.constant 0 : index
    %91 = vector.load %arg7[%c0_43, %c0_44, %c0_45] : memref<2x1x8xf32, #tpu.memory_space<vmem>>, vector<2x1x8xf32>
    %92 = vector.extract_strided_slice %91 {offsets = [0, 0, 0], sizes = [1, 1, 8], strides = [1, 1, 1]} : vector<2x1x8xf32> to vector<1x1x8xf32>
    %93 = vector.shape_cast %92 : vector<1x1x8xf32> to vector<1x8xf32>
    %94 = vector.broadcast %62 : vector<64x1xf32> to vector<64x8xf32>
    %95 = vector.broadcast %93 : vector<1x8xf32> to vector<64x8xf32>
    %96 = arith.mulf %94, %95 : vector<64x8xf32>
    %97 = arith.subf %90, %96 : vector<64x8xf32>
    %98 = vector.broadcast %74 : vector<64x1xf32> to vector<64x8xf32>
    %99 = arith.mulf %98, %97 : vector<64x8xf32>
    %100 = vector.extract_strided_slice %91 {offsets = [1, 0, 0], sizes = [1, 1, 8], strides = [1, 1, 1]} : vector<2x1x8xf32> to vector<1x1x8xf32>
    %101 = vector.shape_cast %100 : vector<1x1x8xf32> to vector<1x8xf32>
    %102 = vector.broadcast %101 : vector<1x8xf32> to vector<64x8xf32>
    %103 = arith.addf %99, %102 : vector<64x8xf32>
    %c0_46 = arith.constant 0 : index
    %c0_47 = arith.constant 0 : index
    %c0_48 = arith.constant 0 : index
    %c0_49 = arith.constant 0 : index
    %104 = vector.load %arg8[%c0_46, %c0_47, %c0_48, %c0_49] : memref<1x1x64x8xf32, #tpu.memory_space<vmem>>, vector<1x1x64x8xf32>
    %105 = vector.shape_cast %104 : vector<1x1x64x8xf32> to vector<64x8xf32>
    %106 = vector.shape_cast %103 : vector<64x8xf32> to vector<1x1x64x8xf32>
    tpu.vector_store %arg8[%c0_46, %c0_47, %c0_48, %c0_49], %106 {strides = array<i32>} : memref<1x1x64x8xf32, #tpu.memory_space<vmem>>, vector<1x1x64x8xf32>,
    return
  }
  func.func @transform_0(%arg0: i32, %arg1: i32, %arg2: i32) -> (i32, i32, i32, i32, i32, i32) {
    %c2_i32 = arith.constant 2 : i32
    %0 = arith.muli %c2_i32, %arg1 : i32
    %c0_i32 = arith.constant 0 : i32
    %c0_i32_0 = arith.constant 0 : i32
    %c0_i32_1 = arith.constant 0 : i32
    %c0_i32_2 = arith.constant 0 : i32
    return %arg0, %0, %arg2, %c0_i32, %c0_i32_0, %c0_i32_1 : i32, i32, i32, i32, i32, i32
  }
  func.func @transform_1(%arg0: i32, %arg1: i32, %arg2: i32) -> (i32, i32, i32, i32, i32, i32) {
    %c2_i32 = arith.constant 2 : i32
    %0 = arith.muli %c2_i32, %arg1 : i32
    %c1_i32 = arith.constant 1 : i32
    %1 = arith.addi %0, %c1_i32 : i32
    %c4_i32 = arith.constant 4 : i32
    %2 = arith.minsi %1, %c4_i32 : i32
    %c0_i32 = arith.constant 0 : i32
    %c0_i32_0 = arith.constant 0 : i32
    %c0_i32_1 = arith.constant 0 : i32
    %c0_i32_2 = arith.constant 0 : i32
    return %arg0, %2, %arg2, %c0_i32, %c0_i32_0, %c0_i32_1 : i32, i32, i32, i32, i32, i32
  }
  func.func @transform_2(%arg0: i32, %arg1: i32, %arg2: i32) -> (i32, i32, i32) {
    %c0_i32 = arith.constant 0 : i32
    %c0_i32_0 = arith.constant 0 : i32
    %c0_i32_1 = arith.constant 0 : i32
    %c0_i32_2 = arith.constant 0 : i32
    return %c0_i32, %c0_i32_0, %c0_i32_1 : i32, i32, i32
  }
  func.func @transform_3(%arg0: i32, %arg1: i32, %arg2: i32) -> (i32, i32, i32) {
    %c0_i32 = arith.constant 0 : i32
    %c0_i32_0 = arith.constant 0 : i32
    %c0_i32_1 = arith.constant 0 : i32
    %c0_i32_2 = arith.constant 0 : i32
    return %c0_i32, %c0_i32_0, %c0_i32_1 : i32, i32, i32
  }
  func.func @transform_4(%arg0: i32, %arg1: i32, %arg2: i32) -> (i32, i32, i32) {
    %c0_i32 = arith.constant 0 : i32
    %c0_i32_0 = arith.constant 0 : i32
    %c0_i32_1 = arith.constant 0 : i32
    %c0_i32_2 = arith.constant 0 : i32
    return %c0_i32, %c0_i32_0, %c0_i32_1 : i32, i32, i32
  }
  func.func @transform_5(%arg0: i32, %arg1: i32, %arg2: i32) -> (i32, i32, i32, i32) {
    %c0_i32 = arith.constant 0 : i32
    %c0_i32_0 = arith.constant 0 : i32
    return %arg0, %arg1, %arg2, %c0_i32 : i32, i32, i32, i32
  }
}

</mosaic_0001>

<bundles_post_ra>
// kernel: tpu_custom_call.1
= control target key start
LH: loop header
LB: loop body
LE: loop exit
PB: predicated region body
PF: predicated region fallthrough
CT: control target
= control target key end

     0   :  { %s2688_s0 = inlined_call_operand.hbm [shape: f32[2,5,8,2,8,8], index: 0, kind: input, shape index: {}]   ;;  %s2689_s1 = inlined_call_operand.hbm [shape: f32[2,5,8,2,8,8], index: 1, kind: input, shape index: {}]   ;;  %s2690_s2 = inlined_call_operand.hbm [shape: f32[4,8,8], index: 2, kind: input, shape index: {}]   ;;  %s2691_s3 = inlined_call_operand.hbm [shape: f32[4,1,8], index: 3, kind: input, shape index: {}]   ;;  %s2692_s4 = inlined_call_operand.vmem [shape: f32[2,1,8], index: 4, kind: input, shape index: {}]   ;;  %s2693_s5 = inlined_call_operand.vmem [shape: f32[2,3,64,8], index: 5, kind: output, shape index: {}]  }
   0x1   :  { %2707 = sst [smem:[#allocation26_spill]] %s2688_s0 }
   0x2   :  { %2708 = sst [smem:[#allocation27_spill]] %s2690_s2 }
   0x3   :  { %2709 = sst [smem:[#allocation28_spill]] %s2691_s3 }
   0x4   :  { %2710 = sst [smem:[#allocation29_spill]] %s2692_s4 }
   0x5   :  { %2711 = sst [smem:[#allocation30_spill]] %s2693_s5 }
   0x6   :  { %10 = vsyncpa [#allocation3], 0 }
   0x7   :  { %12 = vsyncpa [#allocation3 + $0x1], 0 }
   0x8   :  { %13 = vsyncpa [#allocation5], 0 }
   0x9   :  { %15 = vsyncpa [#allocation5 + $0x1], 0 }
   0xa   :  { %16 = vsyncpa [#allocation8], 0  ;;  %s1888_s18 = smov 0   ;;  %s1890_s19 = smov 0  }
   0xb   :  { %s1892_s20 = smov 0   ;;  %s1894_s21 = smov 0  }
   0xc   :  { %s1896_s22 = smov 0   ;;  %s1898_s23 = smov 0  }
   0xd   :  { %s1900_s24 = smov 0   ;;  %s1902_s25 = smov 0  }
   0xe   :  { %s1904_s26 = smov 0   ;;  %s1906_s27 = smov 0  }
   0xf   :  { %s1908_s28 = smov 0  }
  0x10 LB: > { %2712 = sst [smem:[#allocation13_spill]] %s1830_s23  ;;  %s2694_s29 = sadd.s32 4294967295, %s1850_s28   ;;  %s1850_s28 = sphi %s1908_s28, %s22_s28   ;;  %s1846_s27 = sphi %s1906_s27, %s2751_s27   ;;  %s1842_s26 = sphi %s1904_s26, %s2750_s26   ;;  %s1838_s25 = sphi %s1902_s25, %s2758_s25   ;;  %s1834_s24 = sphi %s1900_s24, %s2757_s24   ;;  %s1830_s23 = sphi %s1898_s23, %s2747_s23   ;;  %s1826_s22 = sphi %s1896_s22, %s2756_s22   ;;  %s1822_s21 = sphi %s1894_s21, %s2755_s21   ;;  %s1818_s20 = sphi %s1892_s20, %s2754_s20   ;;  %s1814_s19 = sphi %s1890_s19, %s2753_s19   ;;  %s1810_s18 = sphi %s1888_s18, %s2752_s18  }
  0x11   : > { %2713 = sst [smem:[#allocation14_spill]] %s1834_s24  ;;  %p105_p0 = scmp.ne.s32.totalorder %s1814_s19, %s1810_s18 }
  0x12   : > { %2714 = sst [smem:[#allocation15_spill]] %s1838_s25  ;;  %p1945_p1 = scmp.eq.s32.totalorder %s2694_s29, 0 }
  0x13   : > { %2715 = sst [smem:[#allocation16_spill]] %s1842_s26  ;;  %p1407_p2 = scmp.ge.s32.totalorder %s1850_s28, 1 }
  0x14   : > { %2716 = sst [smem:[#allocation17_spill]] %s1846_s27  ;;  %p209_p3 = scmp.lt.s32.totalorder %s1850_s28, 7 }
  0x15   : > { %p1953_p4 = por %p105_p0, %p1945_p1  ;;  %s2719_s2 = sld [smem:[#allocation27_spill]] }
  0x16   : > { %p1960_p5 = pnand %p1407_p2, %p209_p3  ;;  %s1852_s11 = smov [#allocation6]  }
  0x17   : > { %s222_s12 = sshll.u32 %s1852_s11, 4  ;;  %s2721_s3 = sld [smem:[#allocation28_spill]]  ;;  %s223_s12 = int_to_ptr.vmem [resolvable:$true] %s222_s12 }
  0x18   : > { %p1493_p6 = pneg %p1960_p5  ;;  %s2695_s16 = smov 128  }
  0x19   : > { %s2697_s17 = smov 8   ;;  %s1855_s18 = smov [#allocation7]  }
  0x1a   : > { %p1494_p7 = pnand %p1493_p6, %p1945_p1  ;;  %s236_s7 = sshll.u32 %s1855_s18, 4  ;;  %s237_s7 = int_to_ptr.vmem [resolvable:$true] %s236_s7 }
  0x1b   : > { %s220_s9 = sshll.u32 %s2719_s2, 4  ;;  %s1856_s8 = smov 16   ;;  %s221_s9 = int_to_ptr.hbm [resolvable:$true] %s220_s9 }
  0x1c   : > { %1496 = dma.hbm_to_vmem [thread:$0]  (!%p1494_p7), %s221_s9, 512, %s223_s12, [#allocation5], %s2695_s16, %s2695_s16, %s2697_s17  }
  0x1d   : > { %s234_s15 = sshll.u32 %s2721_s3, 4  ;;  %s1857_s11 = smov 1   ;;  %s235_s15 = int_to_ptr.hbm [resolvable:$true] %s234_s15 }
  0x1e   : > { %1499 = dma.hbm_to_vmem [thread:$0]  (!%p1494_p7), %s235_s15, 64, %s237_s7, [#allocation8], %s1856_s8, %s1856_s8, %s1857_s11  }
  0x1f   : > { %s37_s13 = sadd.s32 1, %s1842_s26  ;;  %s41_s14 = sadd.s32 1, %s1846_s27 }
  0x20   : > { %p39_p8 = scmp.ge.s32.totalorder %s37_s13, 3  ;;  %s1403_s29 = sshll.u32 %s1842_s26, 1 }
  0x21   : > { %s54_s2 = sadd.s32 1, %s1830_s23  ;;  %p61_p9 = scmp.ne.s32.totalorder %s1830_s23, %s1826_s22 }
  0x22   : > { %s2760_s13 = smov (%p39_p8, %s37_s13), 0  ;;  %s2762_s14 = smov (!%p39_p8, %s41_s14), %s1846_s27 }
  0x23   : > { %2722 = sst [smem:[#allocation18_spill]] %s2760_s13  ;;  %s1404_s9 = sshll.u32 %s2760_s13, 1 }
  0x24   : > { %p62_p10 = scmp.eq.s32.totalorder %s1850_s28, 0  ;;  %p43_p11 = scmp.ge.s32.totalorder %s2762_s14, 2 }
  0x25   : > { %s48_s12 = ssub.s32 %s1403_s29, %s1404_s9  ;;  %p67_p13 = scmp.ne.s32.totalorder %s1826_s22, %s1822_s21 }
  0x26   : > { %p1987_p12 = por %p62_p10, %p61_p9  ;;  %s2764_s14 = smov (%p43_p11, %s2762_s14), 0 }
  0x27   : > { %2724 = sst [smem:[#allocation19_spill]] %s2764_s14  ;;  %p1997_p0 = por %p1945_p1, %p67_p13 }
  0x28   : > { %s2001_s7 = sadd.s32 1, %s1403_s29  ;;  %s2005_s8 = ssub.s32 %s1846_s27, %s2764_s14 }
  0x29   : > { %p79_p2 = scmp.lt.s32.totalorder %s2001_s7, 4  ;;  %s49_s11 = sor.u32 %s48_s12, %s2005_s8 }
  0x2a   : > { %s82_s21 = sadd.s32 1, %s1404_s9  ;;  %p52_p3 = scmp.eq.s32.totalorder %s49_s11, 0 }
  0x2b   : > { %p83_p6 = scmp.lt.s32.totalorder %s82_s21, 4  ;;  %p1509_p7 = scmp.lt.s32.totalorder %s1850_s28, 6 }
  0x2c   : > { %s253_s16 = sand.u32 1, %s1830_s23   ;;  %s1477_s3 = sshll.u32 %s1842_s26, 5 }
  0x2d   : > { %s2012_s17 = scalar_select %p52_p3, %s1830_s23, %s54_s2  }
  0x2e   : > { %s2766_s21 = smov (!%p83_p6, %s82_s21), 4  ;;  %s1411_s29 = sshll.u32 %s253_s16, 7 }
  0x2f   : > { %2726 = sst [smem:[#allocation20_spill]] %s2012_s17  ;;  %s1478_s14 = smul.u32 80, %s1846_s27 }
  0x30   : > { %s257_s13 = scalar_lea.vmem [#allocation2], %s1411_s29  ;;  %p1501_p8 = pnand %p1509_p7, %p1987_p12 }
  0x31   : > { %s271_s12 = sshll.u32 %s257_s13, 4  ;;  %s266_s9 = sadd.s32 %s1478_s14, %s1477_s3  ;;  %s272_s12 = int_to_ptr.vmem [resolvable:$true] %s271_s12 }
  0x32   : > { %s1414_s11 = sshll.u32 %s266_s9, 3  ;;  %s2727_s0 = sld [smem:[#allocation26_spill]] }
  0x33   : > { %s92_s26 = sadd.s32 1, %s1818_s20  ;;  %p99_p9 = scmp.ne.s32.totalorder %s1818_s20, %s1814_s19 }
  0x34   : > { %s254_s27 = scalar_lea.sflag [#allocation3], %s253_s16  ;;  %s2728_s29 = smov 8  }
  0x35   : > { %s2729_s13 = smov 128   ;;  %s2768_s7 = smov (!%p79_p2, %s2001_s7), 4 }
  0x36   : > { %p2034_p11 = por %p99_p9, %p62_p10  ;;  %s281_s17 = sand.u32 1, %s1850_s28  }
  0x37   : > { %s86_s15 = ssub.s32 %s2768_s7, %s2766_s21  ;;  %s283_s9 = sand.u32 1, %s1818_s20  }
  0x38   : > { %s268_s23 = scalar_lea.hbm %s2727_s0, %s1414_s11  ;;  %s1415_s11 = sshll.u32 %s283_s9, 7 }
  0x39   : > { %s269_s5 = sshll.u32 %s268_s23, 4  ;;  %s87_s23 = sor.u32 %s86_s15, %s2005_s8  ;;  %s270_s5 = int_to_ptr.hbm [resolvable:$true] %s269_s5 }
  0x3a   : > { %1503 = dma.hbm_to_vmem [thread:$0]  (!%p1501_p8), %s270_s5, 2048, %s272_s12, %s254_s27, %s2729_s13, %s2729_s13, %s2728_s29  }
  0x3b   : > { %p90_p12 = scmp.eq.s32.totalorder %s87_s23, 0  ;;  %s1417_s16 = sshll.u32 %s2768_s7, 4 }
  0x3c   : > { %s297_s0 = sadd.s32 %s1478_s14, %s1417_s16  ;;  %s285_s5 = scalar_lea.vmem [#allocation4], %s1415_s11 }
  0x3d   : > { %s2042_s2 = scalar_select %p90_p12, %s1818_s20, %s92_s26  }
  0x3e   : > { %s302_s27 = sshll.u32 %s285_s5, 4  ;;  %s1418_s12 = sshll.u32 %s297_s0, 3  ;;  %s303_s27 = int_to_ptr.vmem [resolvable:$true] %s302_s27 }
  0x3f   : > { %s299_s24 = scalar_lea.hbm %s2689_s1, %s1418_s12  ;;  %p1504_p10 = pnand %p1509_p7, %p2034_p11 }
  0x40   : > { %s300_s21 = sshll.u32 %s299_s24, 4  ;;  %s282_s8 = scalar_lea.sflag [#allocation5], %s281_s17  ;;  %s301_s21 = int_to_ptr.hbm [resolvable:$true] %s300_s21 }
  0x41   : > { %1506 = dma.hbm_to_vmem [thread:$0]  (!%p1504_p10), %s301_s21, 2048, %s303_s27, %s282_s8, %s2729_s13, %s2729_s13, %s2728_s29  }
  0x42   : > { %314 = sbr.rel (%p1960_p5) target bundleno = 410 (0x19a), region = 40 }
  0x47   : > { %s316_s0 = sand.u32 1, %s1826_s22  }
  0x48   : > { %s1420_s26 = sshll.u32 %s316_s0, 7  ;;  %s317_s14 = scalar_lea.sflag [#allocation3], %s316_s0 }
  0x49   : > { %s2057_s4 = scalar_lea.vmem [#allocation2], %s1420_s26 }
  0x4a   : > { %1793 = dma.done.wait (%p1997_p0), %s317_s14, 2048  }
  0x4b   : > { %1795 = vsyncadd (%p1997_p0), %s317_s14, 4294965248  ;;  %s2731_s24 = sadd.s32 4294967295, %s1850_s28   ;;  %s328_s7 = sand.u32 1, %s1814_s19  }
  0x4c   : > { %s326_s25 = sand.u32 1, %s2731_s24   ;;  %s1421_s10 = sshll.u32 %s328_s7, 7 }
  0x4d   : > { %s327_s29 = scalar_lea.sflag [#allocation5], %s326_s25  ;;  %s2066_s13 = scalar_lea.vmem [#allocation4], %s1421_s10 }
  0x4e   : > { %1797 = dma.done.wait (%p1953_p4), %s327_s29, 2048  }
  0x4f   : > { %1799 = vsyncadd (%p1953_p4), %s327_s29, 4294965248 }
  0x50   : > { %1801 = dma.done.wait (%p1945_p1), [#allocation5], 512  }
  0x51   : > { %1803 = vsyncadd (%p1945_p1), [#allocation5], 4294966784 }
  0x52   : > { %1805 = dma.done.wait (%p1945_p1), [#allocation8], 64  }
  0x53   : > { %1807 = vsyncadd (%p1945_p1), [#allocation8], 4294967232  ;;  %v2081_v0 = vld [vmem:[%s2057_s4 + $0x40] sm:$0xff]  ;;  %vm473_vm0 = vcmask 64512   ;;  %v2093_v7 = vld [vmem:[%s2057_s4 + $0x50] sm:$0xff]  ;;  %s2732_s30 = sld [smem:[#allocation14_spill]] }
  0x54   : > { %v1606_v1 = vld [vmem:[#allocation7] ss:$0 sm:$0xff]  ;;  %v2096_v8 = vld [vmem:[%s2057_s4 + $0x30] sm:$0xff]  ;;  %v1607_v42 = vld [vmem:[#allocation7 + $0x1] ss:$0 sm:$0xff]  ;;  %s2738_s15 = sld [smem:[#allocation15_spill]] }
  0x55   : > { %v2084_v2 = vld [vmem:[%s2057_s4 + $0x20] sm:$0xff]  ;;  %v469_v4 = vmul.f32 %v1606_v1, %v2081_v0  ;;  %v2102_v12 = vld [vmem:[%s2057_s4 + $0x10] sm:$0xff]  ;;  %v470_v13 = vmul.f32 %v1606_v1, %v2093_v7  ;;  %v468_v14 = vmul.f32 %v1606_v1, %v2096_v8  ;;  %v2171_v62 = vld [vmem:[%s2057_s4 + $0x8] sm:$0xff]  ;;  %s2739_s11 = sld [smem:[#allocation29_spill]] }
  0x56   : > { %v2087_v3 = vld [vmem:[%s2057_s4] sm:$0xff]  ;;  %v467_v5 = vmul.f32 %v1606_v1, %v2084_v2  ;;  %v466_v15 = vmul.f32 %v1606_v1, %v2102_v12  ;;  %v2111_v19 = vld [vmem:[%s2057_s4 + $0x70] sm:$0xff]  ;;  %v910_v63 = vld [vmem:[#allocation6 + $0x18] sm:$0xff]  ;;  %s2745_s14 = sld [smem:[#allocation30_spill]] }
  0x57   : > { %v465_v6 = vmul.f32 %v1606_v1, %v2087_v3  ;;  %v486_v9 = vsel %vm473_vm0, %v469_v4, 0.0  ;;  %v489_v16 = vsel %vm473_vm0, %v470_v13, 0.0  ;;  %v483_v17 = vsel %vm473_vm0, %v468_v14, 0.0  ;;  %v2114_v20 = vld [vmem:[%s2057_s4 + $0x60] sm:$0xff]  ;;  %v420_v38 = vld [vmem:[%s2066_s13 + $0x10] sm:$0xff]  ;;  %1153 = vmatpush.msra.mxu3 %v910_v63  ;;  %v1432_v63 = vld [vmem:[%s2057_s4 + $0x68] sm:$0xff] }
  0x58   : > { %v480_v10 = vsel %vm473_vm0, %v467_v5, 0.0  ;;  %487 = vadd.xlane.f32.xlu2 %v486_v9  ;;  %v477_v18 = vsel %vm473_vm0, %v466_v15, 0.0  ;;  %v472_v21 = vmul.f32 %v1606_v1, %v2111_v19  ;;  %v471_v23 = vmul.f32 %v1606_v1, %v2114_v20  ;;  %v419_v36 = vld [vmem:[%s2066_s13] sm:$0xff]  ;;  %v422_v48 = vld [vmem:[%s2066_s13 + $0x30] sm:$0xff] }
  0x59   : > { %v474_v11 = vsel %vm473_vm0, %v465_v6, 0.0  ;;  %481 = vadd.xlane.f32.xlu1 %v480_v10  ;;  %s1442_s6 = sshll.u32 %s2732_s30, 1  ;;  %v498_v22 = vmul.f32 %v465_v6, %v2087_v3  ;;  %v500_v27 = vmul.f32 %v467_v5, %v2084_v2  ;;  %v501_v28 = vmul.f32 %v468_v14, %v2096_v8  ;;  %v423_v49 = vld [vmem:[%s2066_s13 + $0x40] sm:$0xff]  ;;  %v426_v58 = vld [vmem:[%s2066_s13 + $0x70] sm:$0xff]  ;;  %v908_v5 = vld [vmem:[#allocation6 + $0x8] sm:$0xff]  ;;  %p391_p5 = scmp.lt.s32.totalorder %s2732_s30, 2 }
  0x5a   : > { %475 = vadd.xlane.f32.xlu0 %v474_v11  ;;  %s437_s18 = sadd.s32 1, %s1442_s6  ;;  %v495_v24 = vsel %vm473_vm0, %v472_v21, 0.0  ;;  %v492_v26 = vsel %vm473_vm0, %v471_v23, 0.0  ;;  %v499_v29 = vmul.f32 %v466_v15, %v2102_v12  ;;  %v503_v33 = vmul.f32 %v470_v13, %v2093_v7  ;;  %v421_v50 = vld [vmem:[%s2066_s13 + $0x20] sm:$0xff]  ;;  %v909_v61 = vld [vmem:[#allocation6 + $0x10] sm:$0xff]  ;;  %950 = vmatpush.msra.mxu0 %v908_v5  ;;  %p389_p4 = scmp.lt.s32.totalorder %s2738_s15, 1 }
  0x5b   : > { %v506_v25 = vsel %vm473_vm0, %v498_v22, 0.0  ;;  %p438_p1 = scmp.lt.s32.totalorder %s437_s18, 5  ;;  %v512_v30 = vsel %vm473_vm0, %v500_v27, 0.0  ;;  %v515_v31 = vsel %vm473_vm0, %v501_v28, 0.0  ;;  %v504_v34 = vmul.f32 %v471_v23, %v2114_v20  ;;  %v425_v57 = vld [vmem:[%s2066_s13 + $0x60] sm:$0xff]  ;;  %1080 = vmatpush.msra.mxu2 %v909_v61  ;;  %v424_v9 = vld [vmem:[%s2066_s13 + $0x50] sm:$0xff] }
  0x5c   : > { %v509_v32 = vsel %vm473_vm0, %v499_v29, 0.0  ;;  %v502_v35 = vmul.f32 %v469_v4, %v2081_v0  ;;  %v521_v39 = vsel %vm473_vm0, %v503_v33, 0.0  ;;  %v505_v47 = vmul.f32 %v472_v21, %v2111_v19  ;;  %v1434_v4 = vld [vmem:[%s2066_s13 + $0x8] sm:$0xff]  ;;  %v907_v6 = vld [vmem:[#allocation6] sm:$0xff]  ;;  %1459 = vmatmul.msk.f32.vlgmr.msra.gmra.mxu2 %vm473_vm0, %v2171_v62  ;;  %v2202_v22 = vld [vmem:[%s2057_s4 + $0x18] sm:$0xff]  ;;  %s2770_s15 = smov (!%p389_p4, %s2738_s15), 1 }
  0x5d   : > { %s439_s3 = scalar_select %p438_p1, 1, 0  ;;  %v524_v40 = vsel %vm473_vm0, %v504_v34, 0.0  ;;  %1015 = vmatpush.msra.mxu1 %v907_v6  ;;  %v1435_v23 = vld [vmem:[%s2066_s13 + $0x18] sm:$0xff]  ;;  %v1440_v6 = vld [vmem:[%s2066_s13 + $0x68] sm:$0xff] }
  0x5e   : > { %v518_v44 = vsel %vm473_vm0, %v502_v35, 0.0  ;;  %v527_v55 = vsel %vm473_vm0, %v505_v47, 0.0  ;;  %1451 = vmatmul.msk.f32.vlgmr.msra.gmra.mxu1 %vm473_vm0, %v2087_v3  ;;  %s2772_s30 = smov (!%p391_p5, %s2732_s30), 2  ;;  %s1480_s16 = smul.u32 24, %s2770_s15 }
  0x5f   : > { %s440_s17 = scvt.s32.f32 %s439_s3  ;;  %s1424_s5 = sshll.u32 %s2772_s30, 3 }
  0x60   : > { %490 = vadd.xlane.f32.xlu2 %v489_v16  ;;  %s2541_s27 = sadd.s32 %s1480_s16, %s1424_s5 }
  0x61   : > { %484 = vadd.xlane.f32.xlu1 %v483_v17  ;;  %v2133_v37 = vstv %s440_s17  ;;  %s1425_s12 = sshll.u32 %s2541_s27, 3 }
  0x62   : > { %478 = vadd.xlane.f32.xlu0 %v477_v18  ;;  %v2139_v41 = vmul.f32 %v2133_v37, %v419_v36  ;;  %v2142_v43 = vmul.f32 %v2133_v37, %v420_v38  ;;  %v2157_v53 = vmul.f32 %v2133_v37, %v422_v48  ;;  %v2160_v54 = vmul.f32 %v2133_v37, %v423_v49  ;;  %v1438_v48 = vld [vmem:[%s2066_s13 + $0x48] sm:$0xff] }
  0x63   : > { %v444_v56 = vmul.f32 %v2133_v37, %v421_v50  ;;  %v2178_v10 = vmul.f32 %v1434_v4, %v2133_v37  ;;  %v2186_v14 = vmul.f32 %v2133_v37, %v425_v57  ;;  %v2189_v15 = vmul.f32 %v2133_v37, %v426_v58  ;;  %v1430_v50 = vld [vmem:[%s2057_s4 + $0x48] sm:$0xff]  ;;  %v1431_v57 = vld [vmem:[%s2057_s4 + $0x58] sm:$0xff] }
  0x64   : > { %v2146_v45 = vmul.f32 %v1607_v42, %v2139_v41  ;;  %v534_v46 = vmul.f32 %v1607_v42, %v2142_v43  ;;  %v2167_v59 = vmul.f32 %v1607_v42, %v2157_v53  ;;  %v537_v60 = vmul.f32 %v1607_v42, %v2160_v54  ;;  %1443 = vmatmul.msk.f32.vlgmr.msra.gmra.mxu0 %vm473_vm0, %v2139_v41  ;;  %v1439_v58 = vld [vmem:[%s2066_s13 + $0x58] sm:$0xff] }
  0x65   : > { %v535_v1 = vmul.f32 %v1607_v42, %v444_v56  ;;  %1467 = vmatmul.msk.f32.vlgmr.msra.gmra.mxu3 %vm473_vm0, %v2178_v10  ;;  %v2197_v17 = vmul.f32 %v2133_v37, %v424_v9  ;;  %v539_v18 = vmul.f32 %v1607_v42, %v2186_v14  ;;  %v540_v21 = vmul.f32 %v1607_v42, %v2189_v15 }
  0x66   : > { %v541_v51 = vsel %vm473_vm0, %v2146_v45, 0.0  ;;  %v544_v52 = vsel %vm473_vm0, %v534_v46, 0.0  ;;  %v550_v11 = vsel %vm473_vm0, %v2167_v59, 0.0  ;;  %v553_v13 = vsel %vm473_vm0, %v537_v60, 0.0  ;;  %1460 = vmatmul.msk.f32.gmra.mxu2 %vm473_vm0, %v2202_v22  ;;  %1452 = vmatmul.msk.f32.gmra.mxu1 %vm473_vm0, %v2102_v12 }
  0x67   : > { %v547_v16 = vsel %vm473_vm0, %v535_v1, 0.0  ;;  %v2207_v3 = vmul.f32 %v1435_v23, %v2133_v37  ;;  %v566_v28 = vmul.f32 %v534_v46, %v2142_v43  ;;  %v567_v29 = vmul.f32 %v535_v1, %v444_v56 }
  0x68   : > { %507 = vadd.xlane.f32.xlu2 %v506_v25  ;;  %v559_v25 = vsel %vm473_vm0, %v539_v18, 0.0  ;;  %v569_v36 = vmul.f32 %v537_v60, %v2160_v54  ;;  %v572_v46 = vmul.f32 %v540_v21, %v2189_v15  ;;  %v571_v49 = vmul.f32 %v539_v18, %v2186_v14 }
  0x69   : > { %496 = vadd.xlane.f32.xlu1 %v495_v24  ;;  %v538_v24 = vmul.f32 %v1607_v42, %v2197_v17  ;;  %v576_v12 = vsel %vm473_vm0, %v566_v28, 0.0  ;;  %v579_v34 = vsel %vm473_vm0, %v567_v29, 0.0  ;;  %v2302_v9 = vmul.f32 %v1440_v6, %v2133_v37 }
  0x6a   : > { %493 = vadd.xlane.f32.xlu0 %v492_v26  ;;  %v562_v26 = vsel %vm473_vm0, %v540_v21, 0.0  ;;  %v1441_v21 = vld [vmem:[%s2066_s13 + $0x78] sm:$0xff] }
  0x6b   : > { %v556_v27 = vsel %vm473_vm0, %v538_v24, 0.0  ;;  %v570_v38 = vmul.f32 %v538_v24, %v2197_v17  ;;  %v457_v23 = vmul.f32 %v1441_v21, %v2133_v37 }
  0x6c   : > { %1444 = vmatmul.msk.f32.gmra.mxu0 %vm473_vm0, %v2142_v43 }
  0x6d   : > { %1468 = vmatmul.msk.f32.gmra.mxu3 %vm473_vm0, %v2207_v3  ;;  %v588_v43 = vsel %vm473_vm0, %v570_v38, 0.0 }
  0x6e   : > { %1453 = vmatmul.msk.f32.gmra.mxu1 %vm473_vm0, %v2084_v2  ;;  %v585_v2 = vsel %vm473_vm0, %v569_v36, 0.0 }
  0x70   : > { %516 = vadd.xlane.f32.xlu2 %v515_v31  ;;  %v565_v31 = vmul.f32 %v2146_v45, %v2139_v41  ;;  %v2246_v41 = vld [vmem:[%s2057_s4 + $0x38] sm:$0xff] }
  0x71   : > { %513 = vadd.xlane.f32.xlu1 %v512_v30  ;;  %v1436_v30 = vld [vmem:[%s2066_s13 + $0x28] sm:$0xff] }
  0x72   : > { %510 = vadd.xlane.f32.xlu0 %v509_v32  ;;  %v2225_v32 = vld [vmem:[%s2057_s4 + $0x28] sm:$0xff]  ;;  %v2228_v33 = vmul.f32 %v1436_v30, %v2133_v37  ;;  %v573_v35 = vsel %vm473_vm0, %v565_v31, 0.0 }
  0x73   : > { %1461 = vmatmul.msk.f32.gmra.mxu2 %vm473_vm0, %v2225_v32 }
  0x74   : > { %1445 = vmatmul.msk.f32.gmra.mxu0 %vm473_vm0, %v444_v56 }
  0x75   : > { %1469 = vmatmul.msk.f32.gmra.mxu3 %vm473_vm0, %v2228_v33 }
  0x76   : > { %1454 = vmatmul.msk.f32.gmra.mxu1 %vm473_vm0, %v2096_v8  ;;  %v594_v8 = vsel %vm473_vm0, %v572_v46, 0.0 }
  0x78   : > { %525 = vadd.xlane.f32.xlu2 %v524_v40  ;;  %v568_v40 = vmul.f32 %v2167_v59, %v2157_v53  ;;  %v2287_v59 = vmul.f32 %v1439_v58, %v2133_v37 }
  0x79   : > { %522 = vadd.xlane.f32.xlu1 %v521_v39  ;;  %v1437_v39 = vld [vmem:[%s2066_s13 + $0x38] sm:$0xff] }
  0x7a   : > { %519 = vadd.xlane.f32.xlu0 %v518_v44  ;;  %v2249_v42 = vmul.f32 %v1437_v39, %v2133_v37  ;;  %v1608_v44 = vld [vmem:[#allocation7 + $0x2] ss:$0 sm:$0xff]  ;;  %v582_v45 = vsel %vm473_vm0, %v568_v40, 0.0 }
  0x7b   : > { %1462 = vmatmul.msk.f32.gmra.mxu2 %vm473_vm0, %v2246_v41  ;;  %v600_v47 = vmul.f32 %v1608_v44, %v2171_v62  ;;  %v601_v56 = vmul.f32 %v1608_v44, %v2202_v22  ;;  %v605_v1 = vmul.f32 %v1608_v44, %v1431_v57  ;;  %v606_v4 = vmul.f32 %v1608_v44, %v1432_v63 }
  0x7c   : > { %1446 = vmatmul.msk.f32.gmra.mxu0 %vm473_vm0, %v2157_v53  ;;  %v591_v53 = vsel %vm473_vm0, %v571_v49, 0.0  ;;  %v604_v5 = vmul.f32 %v1608_v44, %v1430_v50 }
  0x7d   : > { %1470 = vmatmul.msk.f32.gmra.mxu3 %vm473_vm0, %v2249_v42  ;;  %v611_v61 = vsel %vm473_vm0, %v601_v56, 0.0  ;;  %v637_v29 = vmul.f32 %v1431_v57, %v605_v1 }
  0x7e   : > { %1455 = vmatmul.msk.f32.gmra.mxu1 %vm473_vm0, %v2081_v0 }
  0x7f   : > { %v655_v36 = vsel %vm473_vm0, %v637_v29, 0.0 }
  0x80   : > { %545 = vadd.xlane.f32.xlu2 %v544_v52  ;;  %v608_v52 = vsel %vm473_vm0, %v600_v47, 0.0 }
  0x81   : > { %542 = vadd.xlane.f32.xlu1 %v541_v51  ;;  %v2268_v51 = vmul.f32 %v1438_v48, %v2133_v37  ;;  %v636_v37 = vmul.f32 %v1430_v50, %v604_v5 }
  0x82   : > { %528 = vadd.xlane.f32.xlu0 %v527_v55  ;;  %v602_v55 = vmul.f32 %v1608_v44, %v2225_v32 }
  0x83   : > { %1463 = vmatmul.msk.f32.gmra.mxu2 %vm473_vm0, %v1430_v50 }
  0x84   : > { %1447 = vmatmul.msk.f32.gmra.mxu0 %vm473_vm0, %v2160_v54  ;;  %v603_v54 = vmul.f32 %v1608_v44, %v2246_v41  ;;  %v614_v0 = vsel %vm473_vm0, %v602_v55, 0.0 }
  0x85   : > { %1471 = vmatmul.msk.f32.gmra.mxu3 %vm473_vm0, %v2268_v51 }
  0x86   : > { %v617_v60 = vsel %vm473_vm0, %v603_v54, 0.0  ;;  %1456 = vmatmul.msk.f32.gmra.mxu1 %vm473_vm0, %v2093_v7  ;;  %v623_v7 = vsel %vm473_vm0, %v605_v1, 0.0 }
  0x88   : > { %554 = vadd.xlane.f32.xlu2 %v553_v13  ;;  %v620_v13 = vsel %vm473_vm0, %v604_v5, 0.0 }
  0x89   : > { %551 = vadd.xlane.f32.xlu1 %v550_v11  ;;  %v626_v11 = vsel %vm473_vm0, %v606_v4, 0.0 }
  0x8a   : > { %548 = vadd.xlane.f32.xlu0 %v547_v16  ;;  %v1433_v16 = vld [vmem:[%s2057_s4 + $0x78] sm:$0xff]  ;;  %s2588_s4 = scalar_lea.vmem %s2745_s14, %s1425_s12 }
  0x8b   : > { %1464 = vmatmul.msk.f32.gmra.mxu2 %vm473_vm0, %v1431_v57  ;;  %v607_v18 = vmul.f32 %v1608_v44, %v1433_v16 }
  0x8c   : > { %1448 = vmatmul.msk.f32.gmra.mxu0 %vm473_vm0, %v2197_v17  ;;  %v632_v17 = vmul.f32 %v2171_v62, %v600_v47 }
  0x8d   : > { %1472 = vmatmul.msk.f32.gmra.mxu3 %vm473_vm0, %v2287_v59  ;;  %v629_v62 = vsel %vm473_vm0, %v607_v18, 0.0  ;;  %v639_v28 = vmul.f32 %v1433_v16, %v607_v18 }
  0x8e   : > { %1457 = vmatmul.msk.f32.gmra.mxu1 %vm473_vm0, %v2114_v20  ;;  %v640_v20 = vsel %vm473_vm0, %v632_v17, 0.0 }
  0x90   : > { %563 = vadd.xlane.f32.xlu2 %v562_v26  ;;  %v652_v26 = vsel %vm473_vm0, %v636_v37, 0.0 }
  0x91   : > { %560 = vadd.xlane.f32.xlu1 %v559_v25  ;;  %v634_v25 = vmul.f32 %v2225_v32, %v602_v55  ;;  %v661_v32 = vsel %vm473_vm0, %v639_v28, 0.0 }
  0x92   : > { %557 = vadd.xlane.f32.xlu0 %v556_v27 }
  0x93   : > { %1465 = vmatmul.msk.f32.gmra.mxu2 %vm473_vm0, %v1432_v63  ;;  %v646_v27 = vsel %vm473_vm0, %v634_v25, 0.0 }
  0x94   : > { %1449 = vmatmul.msk.f32.gmra.mxu0 %vm473_vm0, %v2186_v14  ;;  %v633_v14 = vmul.f32 %v2202_v22, %v601_v56  ;;  %v635_v22 = vmul.f32 %v2246_v41, %v603_v54 }
  0x95   : > { %1473 = vmatmul.msk.f32.gmra.mxu3 %vm473_vm0, %v2302_v9 }
  0x96   : > { %v643_v24 = vsel %vm473_vm0, %v633_v14, 0.0  ;;  %1458 = vmatmul.msk.f32.gmra.mxu1 %vm473_vm0, %v2111_v19  ;;  %v638_v19 = vmul.f32 %v1432_v63, %v606_v4 }
  0x98   : > { %580 = vadd.xlane.f32.xlu2 %v579_v34  ;;  %v658_v34 = vsel %vm473_vm0, %v638_v19, 0.0 }
  0x99   : > { %577 = vadd.xlane.f32.xlu1 %v576_v12 }
  0x9a   : > { %574 = vadd.xlane.f32.xlu0 %v573_v35  ;;  %v1609_v35 = vld [vmem:[#allocation7 + $0x3] ss:$0 sm:$0xff] }
  0x9b   : > { %1466 = vmatmul.msk.f32.gmra.mxu2 %vm473_vm0, %v1433_v16  ;;  %v668_v38 = vmul.f32 %v1609_v35, %v2207_v3  ;;  %v669_v39 = vmul.f32 %v1609_v35, %v2228_v33  ;;  %v667_v40 = vmul.f32 %v1609_v35, %v2178_v10  ;;  %v671_v47 = vmul.f32 %v1609_v35, %v2268_v51 }
  0x9c   : > { %1450 = vmatmul.msk.f32.gmra.mxu0 %vm473_vm0, %v2189_v15  ;;  %v649_v15 = vsel %vm473_vm0, %v635_v22, 0.0  ;;  %v672_v48 = vmul.f32 %v1609_v35, %v2287_v59  ;;  %v670_v49 = vmul.f32 %v1609_v35, %v2249_v42 }
  0x9d   : > { %1474 = vmatmul.msk.f32.gmra.mxu3 %vm473_vm0, %v457_v23  ;;  %v678_v44 = vsel %vm473_vm0, %v668_v38, 0.0  ;;  %v675_v46 = vsel %vm473_vm0, %v667_v40, 0.0  ;;  %v687_v55 = vsel %vm473_vm0, %v671_v47, 0.0  ;;  %v699_v58 = vmul.f32 %v667_v40, %v2178_v10 }
  0x9e   : > { %v690_v54 = vsel %vm473_vm0, %v672_v48, 0.0  ;;  %v684_v57 = vsel %vm473_vm0, %v670_v49, 0.0  ;;  %v701_v6 = vmul.f32 %v669_v39, %v2228_v33  ;;  %v700_v10 = vmul.f32 %v668_v38, %v2207_v3 }
  0x9f   : > { %v707_v4 = vsel %vm473_vm0, %v699_v58, 0.0  ;;  %v704_v21 = vmul.f32 %v672_v48, %v2287_v59 }
  0xa0   : > { %589 = vadd.xlane.f32.xlu2 %v588_v43  ;;  %v713_v17 = vsel %vm473_vm0, %v701_v6, 0.0  ;;  %v710_v18 = vsel %vm473_vm0, %v700_v10, 0.0 }
  0xa1   : > { %586 = vadd.xlane.f32.xlu1 %v585_v2  ;;  %v722_v22 = vsel %vm473_vm0, %v704_v21, 0.0 }
  0xa2   : > { %583 = vadd.xlane.f32.xlu0 %v582_v45  ;;  %v681_v45 = vsel %vm473_vm0, %v669_v39, 0.0 }
  0xa8   : > { %609 = vadd.xlane.f32.xlu2 %v608_v52  ;;  %v674_v52 = vmul.f32 %v1609_v35, %v457_v23 }
  0xa9   : > { %595 = vadd.xlane.f32.xlu1 %v594_v8 }
  0xaa   : > { %592 = vadd.xlane.f32.xlu0 %v591_v53  ;;  %v706_v56 = vmul.f32 %v674_v52, %v457_v23  ;;  %v696_v1 = vsel %vm473_vm0, %v674_v52, 0.0 }
  0xac   : > { %v728_v19 = vsel %vm473_vm0, %v706_v56, 0.0 }
  0xb0   : > { %618 = vadd.xlane.f32.xlu2 %v617_v60 }
  0xb1   : > { %615 = vadd.xlane.f32.xlu1 %v614_v0  ;;  %v673_v0 = vmul.f32 %v1609_v35, %v2302_v9 }
  0xb2   : > { %612 = vadd.xlane.f32.xlu0 %v611_v61 }
  0xb3   : > { %v693_v5 = vsel %vm473_vm0, %v673_v0, 0.0  ;;  %v705_v33 = vmul.f32 %v673_v0, %v2302_v9 }
  0xb5   : > { %v725_v37 = vsel %vm473_vm0, %v705_v33, 0.0 }
  0xb8   : > { %627 = vadd.xlane.f32.xlu2 %v626_v11 }
  0xb9   : > { %624 = vadd.xlane.f32.xlu1 %v623_v7  ;;  %v702_v7 = vmul.f32 %v670_v49, %v2249_v42  ;;  %v703_v42 = vmul.f32 %v671_v47, %v2268_v51 }
  0xba   : > { %621 = vadd.xlane.f32.xlu0 %v620_v13 }
  0xbb   : > { %v716_v14 = vsel %vm473_vm0, %v702_v7, 0.0  ;;  %v719_v25 = vsel %vm473_vm0, %v703_v42, 0.0 }
  0xc0   : > { %644 = vadd.xlane.f32.xlu2 %v643_v24 }
  0xc1   : > { %641 = vadd.xlane.f32.xlu1 %v640_v20 }
  0xc2   : > { %630 = vadd.xlane.f32.xlu0 %v629_v62 }
  0xc8   : > { %653 = vadd.xlane.f32.xlu2 %v652_v26 }
  0xc9   : > { %650 = vadd.xlane.f32.xlu1 %v649_v15 }
  0xca   : > { %647 = vadd.xlane.f32.xlu0 %v646_v27 }
  0xcb   : > { %v2332_v30 = vpop.xlane.xlu2 %487 }
  0xcc   : > { %v2334_v31 = vpop.xlane.xlu1 %481 }
  0xcd   : > { %v476_v12 = vpop.xlane.xlu0 %475 }
  0xd0   : > { %662 = vadd.xlane.f32.xlu2 %v661_v32 }
  0xd1   : > { %659 = vadd.xlane.f32.xlu1 %v658_v34 }
  0xd2   : > { %656 = vadd.xlane.f32.xlu0 %v655_v36 }
  0xd3   : > { %v2342_v41 = vpop.xlane.xlu2 %490 }
  0xd4   : > { %v485_v2 = vpop.xlane.xlu1 %484 }
  0xd5   : > { %v479_v43 = vpop.xlane.xlu0 %478 }
  0xd8   : > { %682 = vadd.xlane.f32.xlu2 %v681_v45 }
  0xd9   : > { %679 = vadd.xlane.f32.xlu1 %v678_v44 }
  0xda   : > { %676 = vadd.xlane.f32.xlu0 %v675_v46 }
  0xdb   : > { %v2350_v8 = vpop.xlane.xlu2 %507  ;;  %v1017_v58 = vpop.f32.mrf.mxu1 }
  0xdc   : > { %v497_v50 = vpop.xlane.xlu1 %496 }
  0xdd   : > { %v494_v53 = vpop.xlane.xlu0 %493 }
  0xe0   : > { %691 = vadd.xlane.f32.xlu2 %v690_v54 }
  0xe1   : > { %688 = vadd.xlane.f32.xlu1 %v687_v55 }
  0xe2   : > { %685 = vadd.xlane.f32.xlu0 %v684_v57 }
  0xe3   : > { %v517_v61 = vpop.xlane.xlu2 %516  ;;  %v1020_v7 = vpop.f32.mrf.mxu1 }
  0xe4   : > { %v514_v60 = vpop.xlane.xlu1 %513 }
  0xe5   : > { %v511_v63 = vpop.xlane.xlu0 %510 }
  0xe8   : > { %708 = vadd.xlane.f32.xlu2 %v707_v4 }
  0xe9   : > { %697 = vadd.xlane.f32.xlu1 %v696_v1 }
  0xea   : > { %694 = vadd.xlane.f32.xlu0 %v693_v5 }
  0xeb   : > { %v526_v13 = vpop.xlane.xlu2 %525 }
  0xec   : > { %v523_v11 = vpop.xlane.xlu1 %522 }
  0xed   : > { %v520_v16 = vpop.xlane.xlu0 %519 }
  0xf0   : > { %717 = vadd.xlane.f32.xlu2 %v716_v14 }
  0xf1   : > { %714 = vadd.xlane.f32.xlu1 %v713_v17 }
  0xf2   : > { %711 = vadd.xlane.f32.xlu0 %v710_v18  ;;  %v1023_v18 = vpop.f32.mrf.mxu1 }
  0xf3   : > { %v546_v3 = vpop.xlane.xlu2 %545 }
  0xf4   : > { %v543_v23 = vpop.xlane.xlu1 %542  ;;  %v2371_v24 = vadd.f32 %v546_v3, %v479_v43 }
  0xf5   : > { %v2369_v20 = vadd.f32 %v543_v23, %v476_v12  ;;  %v529_v62 = vpop.xlane.xlu0 %528 }
  0xf8   : > { %726 = vadd.xlane.f32.xlu2 %v725_v37 }
  0xf9   : > { %723 = vadd.xlane.f32.xlu1 %v722_v22 }
  0xfa   : > { %720 = vadd.xlane.f32.xlu0 %v719_v25  ;;  %v1026_v22 = vpop.f32.mrf.mxu1 }
  0xfb   : > { %v555_v9 = vpop.xlane.xlu2 %554 }
  0xfc   : > { %v552_v59 = vpop.xlane.xlu1 %551  ;;  %v2379_v51 = vadd.f32 %v555_v9, %v2332_v30 }
  0xfd   : > { %v2376_v15 = vadd.f32 %v552_v59, %v485_v2  ;;  %v549_v26 = vpop.xlane.xlu0 %548 }
  0xfe   : > { %v2382_v27 = vadd.f32 %v549_v26, %v2334_v31 }
 0x102   : > { %729 = vadd.xlane.f32.xlu0 %v728_v19 }
 0x103   : > { %v564_v29 = vpop.xlane.xlu2 %563 }
 0x104   : > { %v561_v28 = vpop.xlane.xlu1 %560  ;;  %v738_v34 = vadd.f32 %v564_v29, %v497_v50 }
 0x105   : > { %v2385_v12 = vadd.f32 %v561_v28, %v494_v53  ;;  %v558_v32 = vpop.xlane.xlu0 %557 }
 0x106   : > { %v2388_v35 = vadd.f32 %v558_v32, %v2342_v41  ;;  %v1029_v32 = vpop.f32.mrf.mxu1 }
 0x10b   : > { %v581_v38 = vpop.xlane.xlu2 %580 }
 0x10c   : > { %v578_v36 = vpop.xlane.xlu1 %577  ;;  %v2392_v39 = vadd.f32 %v581_v38, %v514_v60  ;;  %v1082_v60 = vpop.f32.mrf.mxu2 }
 0x10d   : > { %v2390_v30 = vadd.f32 %v578_v36, %v511_v63  ;;  %v575_v31 = vpop.xlane.xlu0 %574 }
 0x10e   : > { %v763_v40 = vadd.f32 %v575_v31, %v2350_v8  ;;  %v952_v8 = vpop.f32.mrf.mxu0 }
 0x10f   : > { %v1018_v31 = vadd.f32 %v1017_v58, %v952_v8 }
 0x113   : > { %v590_v43 = vpop.xlane.xlu2 %589 }
 0x114   : > { %v587_v2 = vpop.xlane.xlu1 %586  ;;  %v2397_v45 = vadd.f32 %v590_v43, %v523_v11  ;;  %v1085_v10 = vpop.f32.mrf.mxu2 }
 0x115   : > { %v2395_v44 = vadd.f32 %v587_v2, %v520_v16  ;;  %v584_v46 = vpop.xlane.xlu0 %583 }
 0x116   : > { %v2399_v47 = vadd.f32 %v584_v46, %v517_v61  ;;  %v1155_v61 = vpop.f32.mrf.mxu3  ;;  %v955_v4 = vpop.f32.mrf.mxu0 }
 0x117   : > { %2733 = vst [vmem:[#allocation21_spill] sm:$0xff] %v2395_v44  ;;  %v1021_v2 = vadd.f32 %v1020_v7, %v955_v4  ;;  %v1106_v44 = vadd.f32 %v1082_v60, %v1018_v31  ;;  %v1032_v7 = vpop.f32.mrf.mxu1 }
 0x11b   : > { %v610_v48 = vpop.xlane.xlu2 %609 }
 0x11c   : > { %v596_v41 = vpop.xlane.xlu1 %595  ;;  %v1088_v42 = vpop.f32.mrf.mxu2 }
 0x11d   : > { %v2401_v49 = vadd.f32 %v596_v41, %v529_v62  ;;  %v593_v50 = vpop.xlane.xlu0 %592 }
 0x11e   : > { %v2403_v52 = vadd.f32 %v593_v50, %v526_v13  ;;  %v1158_v17 = vpop.f32.mrf.mxu3  ;;  %v958_v14 = vpop.f32.mrf.mxu0 }
 0x11f   : > { %2734 = vst [vmem:[#allocation22_spill] sm:$0xff] %v2401_v49  ;;  %v1024_v46 = vadd.f32 %v1023_v18, %v958_v14 }
 0x121   : > { %v1108_v58 = vadd.f32 %v1088_v42, %v1024_v46 }
 0x123   : > { %v619_v55 = vpop.xlane.xlu2 %618 }
 0x124   : > { %v616_v53 = vpop.xlane.xlu1 %615  ;;  %v1091_v9 = vpop.f32.mrf.mxu2 }
 0x125   : > { %v613_v54 = vpop.xlane.xlu0 %612 }
 0x126   : > { %v1161_v3 = vpop.f32.mrf.mxu3  ;;  %v961_v62 = vpop.f32.mrf.mxu0  ;;  %v740_v8 = vadd.f32 %v2371_v24, %v613_v54 }
 0x127   : > { %v1027_v4 = vadd.f32 %v1026_v22, %v961_v62 }
 0x12b   : > { %v2407_v57 = vpop.xlane.xlu2 %627 }
 0x12c   : > { %v2405_v56 = vpop.xlane.xlu1 %624  ;;  %v1094_v43 = vpop.f32.mrf.mxu2 }
 0x12d   : > { %v2409_v0 = vpop.xlane.xlu0 %621 }
 0x12e   : > { %v2423_v26 = vpop.f32.mrf.mxu3  ;;  %v964_v19 = vpop.f32.mrf.mxu0 }
 0x12f   : > { %v1030_v24 = vadd.f32 %v1029_v32, %v964_v19 }
 0x133   : > { %v2411_v1 = vpop.xlane.xlu2 %644 }
 0x134   : > { %v642_v63 = vpop.xlane.xlu1 %641  ;;  %v1097_v22 = vpop.f32.mrf.mxu2 }
 0x135   : > { %v631_v5 = vpop.xlane.xlu0 %630  ;;  %v771_v41 = vadd.f32 %v763_v40, %v642_v63 }
 0x136   : > { %v2413_v6 = vadd.f32 %v738_v34, %v631_v5  ;;  %v739_v34 = vadd.f32 %v2369_v20, %v610_v48  ;;  %v741_v5 = vadd.f32 %v2382_v27, %v616_v53  ;;  %v2434_v20 = vpop.f32.mrf.mxu3  ;;  %v967_v63 = vpop.f32.mrf.mxu0 }
 0x138   : > { %2735 = vst [vmem:[#allocation23_spill] sm:$0xff] %v2413_v6 }
 0x13b   : > { %v2415_v13 = vpop.xlane.xlu2 %653 }
 0x13c   : > { %v651_v11 = vpop.xlane.xlu1 %650  ;;  %2736 = vst [vmem:[#allocation24_spill] sm:$0xff] %v2415_v13  ;;  %v1107_v13 = vadd.f32 %v1085_v10, %v1021_v2  ;;  %v1109_v10 = vadd.f32 %v1091_v9, %v1027_v4  ;;  %v1035_v2 = vpop.f32.mrf.mxu1 }
 0x13d   : > { %v648_v16 = vpop.xlane.xlu0 %647  ;;  %v774_v42 = vadd.f32 %v2399_v47, %v651_v11 }
 0x13e   : > { %v773_v62 = vadd.f32 %v2392_v39, %v648_v16  ;;  %v743_v39 = vadd.f32 %v2379_v51, %v2409_v0  ;;  %v970_v31 = vpop.f32.mrf.mxu0 }
 0x143   : > { %v2419_v33 = vpop.xlane.xlu2 %662 }
 0x144   : > { %v2417_v21 = vpop.xlane.xlu1 %659  ;;  %2737 = vst [vmem:[#allocation25_spill] sm:$0xff] %v2419_v33  ;;  %v742_v33 = vadd.f32 %v2376_v15, %v619_v55  ;;  %v2439_v15 = vadd.f32 %v1155_v61, %v1106_v44  ;;  %v2441_v55 = vadd.f32 %v1158_v17, %v1107_v13  ;;  %v744_v44 = vadd.f32 %v2388_v35, %v2405_v56 }
 0x145   : > { %v2421_v23 = vpop.xlane.xlu0 %656  ;;  %v745_v61 = vadd.f32 %v2385_v12, %v2407_v57  ;;  %v772_v13 = vadd.f32 %v2390_v30, %v2411_v1  ;;  %v1033_v35 = vadd.f32 %v1032_v7, %v967_v63  ;;  %v1170_v57 = vpop.f32.mrf.mxu3  ;;  %v2741_v63 = vld [vmem:[#allocation21_spill] sm:$0xff] }
 0x14b   : > { %v683_v25 = vpop.xlane.xlu2 %682 }
 0x14c   : > { %v680_v37 = vpop.xlane.xlu1 %679  ;;  %v749_v40 = vadd.f32 %v741_v5, %v683_v25  ;;  %v777_v5 = vadd.f32 %v2403_v52, %v2417_v21 }
 0x14d   : > { %v677_v59 = vpop.xlane.xlu0 %676  ;;  %v748_v18 = vadd.f32 %v740_v8, %v680_v37 }
 0x14e   : > { %v747_v38 = vadd.f32 %v739_v34, %v677_v59  ;;  %v2445_v54 = vmul.f32 0.03125, %v749_v40  ;;  %v2740_v40 = vld [vmem:[#allocation24_spill] sm:$0xff] }
 0x14f   : > { %v2457_v17 = vmul.f32 0.03125, %v748_v18  ;;  %v775_v52 = vadd.f32 %v2741_v63, %v2740_v40 }
 0x150   : > { %v2428_v50 = vmul.f32 0.03125, %v747_v38  ;;  %v797_v12 = vmul.f32 %v2445_v54, %v2445_v54  ;;  %v2475_v38 = vadd.f32 %v1094_v43, %v1030_v24  ;;  %v2485_v43 = vld [vmem:[%s2739_s11] ss:$0 sm:$0xff] }
 0x151   : > { %v796_v19 = vmul.f32 %v2457_v17, %v2457_v17 }
 0x152   : > { %v795_v27 = vmul.f32 %v2428_v50, %v2428_v50 }
 0x153   : > { %v692_v29 = vpop.xlane.xlu2 %691 }
 0x154   : > { %v2425_v28 = vpop.xlane.xlu1 %688  ;;  %v752_v56 = vadd.f32 %v744_v44, %v692_v29  ;;  %v2473_v29 = vadd.f32 %v2423_v26, %v1109_v10  ;;  %v776_v26 = vadd.f32 %v2397_v45, %v2421_v23 }
 0x155   : > { %v686_v36 = vpop.xlane.xlu0 %685  ;;  %v751_v34 = vadd.f32 %v743_v39, %v2425_v28  ;;  %v1036_v28 = vadd.f32 %v1035_v2, %v970_v31  ;;  %v2539_v2 = vmul.f32 %v2485_v43, %v2457_v17 }
 0x156   : > { %v750_v53 = vadd.f32 %v742_v33, %v686_v36  ;;  %v2487_v8 = vmul.f32 0.03125, %v752_v56 }
 0x157   : > { %v2491_v21 = vmul.f32 0.03125, %v751_v34  ;;  %v2744_v34 = vld [vmem:[#allocation23_spill] sm:$0xff] }
 0x158   : > { %v2449_v25 = vmul.f32 0.03125, %v750_v53 }
 0x15a   : > { %v798_v1 = vmul.f32 %v2449_v25, %v2449_v25 }
 0x15b   : > { %v709_v49 = vpop.xlane.xlu2 %708 }
 0x15c   : > { %v2431_v6 = vpop.xlane.xlu1 %697  ;;  %v779_v48 = vadd.f32 %v771_v41, %v709_v49  ;;  %v2443_v49 = vadd.f32 %v1161_v3, %v1108_v58 }
 0x15d   : > { %v695_v59 = vpop.xlane.xlu0 %694 }
 0x15e   : > { %v787_v14 = vmul.f32 0.03125, %v779_v48  ;;  %v753_v32 = vadd.f32 %v745_v61, %v695_v59  ;;  %v1111_v48 = vadd.f32 %v1097_v22, %v1033_v35  ;;  %v1192_v61 = vmul.f32 %v2485_v43, %v2428_v50 }
 0x160   : > { %v803_v60 = vsub.f32 %v787_v14, %v795_v27  ;;  %v2498_v7 = vmul.f32 0.03125, %v753_v32  ;;  %v1100_v14 = vpop.f32.mrf.mxu2  ;;  %v754_v32 = vadd.f32 %v2744_v34, %v2431_v6  ;;  %v1200_v6 = vsub.f32 %v2439_v15, %v1192_v61 }
 0x162   : > { %v811_v33 = vmax.f32 %v803_v60, 0.0  ;;  %v801_v39 = vmul.f32 %v2498_v7, %v2498_v7  ;;  %v2563_v15 = vmul.f32 0.03125, %v754_v32 }
 0x163   : > { %v718_v37 = vpop.xlane.xlu2 %717 }
 0x164   : > { %v715_v3 = vpop.xlane.xlu1 %714  ;;  %v2461_v47 = vadd.f32 1e-05, %v811_v33  ;;  %v782_v16 = vadd.f32 %v774_v42, %v718_v37 }
 0x165   : > { %v781_v11 = vadd.f32 %v773_v62, %v715_v3  ;;  %v712_v9 = vpop.xlane.xlu0 %711  ;;  %v1112_v62 = vadd.f32 %v1100_v14, %v1036_v28 }
 0x166   : > { %v780_v30 = vadd.f32 %v772_v13, %v712_v9  ;;  %1612 = vrsqrt.f32 %v2461_v47  ;;  %v790_v0 = vmul.f32 0.03125, %v782_v16  ;;  %v800_v13 = vmul.f32 %v2487_v8, %v2487_v8  ;;  %v1173_v9 = vpop.f32.mrf.mxu3 }
 0x167   : > { %v789_v51 = vmul.f32 0.03125, %v781_v11  ;;  %v799_v16 = vmul.f32 %v2491_v21, %v2491_v21  ;;  %v2531_v56 = vadd.f32 %v1173_v9, %v1112_v62  ;;  %vm833_vm2 = vweird.f32 %v2461_v47 }
 0x168   : > { %v788_v36 = vmul.f32 0.03125, %v780_v30  ;;  %v806_v41 = vsub.f32 %v790_v0, %v798_v1  ;;  %v2743_v0 = vld [vmem:[#allocation22_spill] sm:$0xff] }
 0x169   : > { %v805_v46 = vsub.f32 %v789_v51, %v797_v12  ;;  %v2529_v12 = vadd.f32 %v1170_v57, %v1111_v48  ;;  %v2742_v51 = vld [vmem:[#allocation25_spill] sm:$0xff] }
 0x16a   : > { %v804_v59 = vsub.f32 %v788_v36, %v796_v19  ;;  %v814_v4 = vmax.f32 %v806_v41, 0.0  ;;  %v778_v19 = vadd.f32 %v2743_v0, %v2742_v51  ;;  %v1197_v0 = vmul.f32 %v2485_v43, %v2487_v8 }
 0x16b   : > { %v813_v58 = vmax.f32 %v805_v46, 0.0  ;;  %v727_v27 = vpop.xlane.xlu2 %726 }
 0x16c   : > { %v812_v45 = vmax.f32 %v804_v59, 0.0  ;;  %v724_v23 = vpop.xlane.xlu1 %723  ;;  %v2500_v53 = vpop.eup %1612  ;;  %v2509_v60 = vadd.f32 1e-05, %v814_v4  ;;  %v785_v24 = vadd.f32 %v777_v5, %v727_v27  ;;  %v1194_v5 = vmul.f32 %v2485_v43, %v2445_v54 }
 0x16d   : > { %v2507_v18 = vadd.f32 1e-05, %v813_v58  ;;  %v784_v10 = vadd.f32 %v776_v26, %v724_v23  ;;  %v721_v42 = vpop.xlane.xlu0 %720  ;;  %v828_v22 = vmul.f32 %v2500_v53, %v2461_v47  ;;  %vm834_vm1 = vweird.f32 %v2500_v53  ;;  %v2569_v47 = vld [vmem:[%s2739_s11 + $0x1] ss:$0 sm:$0xff] }
 0x16e   : > { %v2513_v33 = vadd.f32 1e-05, %v812_v45  ;;  %v783_v44 = vadd.f32 %v775_v52, %v721_v42  ;;  %v793_v11 = vmul.f32 0.03125, %v785_v24  ;;  %v1195_v54 = vmul.f32 %v2485_v43, %v2449_v25  ;;  %vm835_vm3 = vmor %vm833_vm2, %vm834_vm1 }
 0x16f   : > { %1614 = vrsqrt.f32 %v2507_v18  ;;  %v792_v3 = vmul.f32 0.03125, %v784_v10  ;;  %v829_v37 = vmul.f32 %v2500_v53, %v828_v22  ;;  %v1201_v25 = vsub.f32 %v2441_v55, %v2539_v2 }
 0x170   : > { %1616 = vrsqrt.f32 %v2509_v60  ;;  %v791_v35 = vmul.f32 0.03125, %v783_v44  ;;  %v809_v1 = vsub.f32 %v793_v11, %v801_v39  ;;  %v1202_v27 = vsub.f32 %v2443_v49, %v1194_v5 }
 0x171   : > { %1618 = vrsqrt.f32 %v2513_v33  ;;  %v808_v50 = vsub.f32 %v792_v3, %v800_v13  ;;  %v830_v30 = vmul.f32 0.5, %v829_v37  ;;  %v1203_v62 = vsub.f32 %v2473_v29, %v1195_v54 }
 0x172   : > { %v807_v31 = vsub.f32 %v791_v35, %v799_v16  ;;  %v817_v46 = vmax.f32 %v809_v1, 0.0  ;;  %v802_v49 = vmul.f32 %v2563_v15, %v2563_v15  ;;  %vm853_vm5 = vweird.f32 %v2507_v18 }
 0x173   : > { %v816_v36 = vmax.f32 %v808_v50, 0.0  ;;  %v831_v57 = vsub.f32 1.5, %v830_v30  ;;  %vm863_vm9 = vweird.f32 %v2509_v60  ;;  %vm843_vm10 = vweird.f32 %v2513_v33 }
 0x174   : > { %v2557_v26 = vadd.f32 1e-05, %v817_v46  ;;  %v815_v58 = vmax.f32 %v807_v31, 0.0 }
 0x175   : > { %v2544_v41 = vpop.eup %1614  ;;  %v2550_v48 = vadd.f32 1e-05, %v816_v36  ;;  %v832_v28 = vmul.f32 %v2500_v53, %v831_v57  ;;  %v730_v63 = vpop.xlane.xlu0 %729 }
 0x176   : > { %v2552_v17 = vpop.eup %1616  ;;  %v848_v59 = vmul.f32 %v2544_v41, %v2507_v18  ;;  %v2591_v24 = vadd.f32 1e-05, %v815_v58  ;;  %v786_v42 = vadd.f32 %v778_v19, %v730_v63  ;;  %vm854_vm4 = vweird.f32 %v2544_v41 }
 0x177   : > { %v2559_v4 = vpop.eup %1618  ;;  %v858_v40 = vmul.f32 %v2552_v17, %v2509_v60  ;;  %1620 = vrsqrt.f32 %v2550_v48  ;;  %v836_v52 = vsel %vm835_vm3, %v2500_v53, %v832_v28  ;;  %vm864_vm6 = vweird.f32 %v2552_v17  ;;  %vm855_vm8 = vmor %vm853_vm5, %vm854_vm4 }
 0x178   : > { %v849_v45 = vmul.f32 %v2544_v41, %v848_v59  ;;  %v838_v23 = vmul.f32 %v2559_v4, %v2513_v33  ;;  %v1208_v14 = vmul.f32 %v1200_v6, %v836_v52  ;;  %1622 = vrsqrt.f32 %v2557_v26  ;;  %vm865_vm11 = vmor %vm863_vm9, %vm864_vm6 }
 0x179   : > { %v859_v10 = vmul.f32 %v2552_v17, %v858_v40  ;;  %1624 = vrsqrt.f32 %v2591_v24  ;;  %v794_v29 = vmul.f32 0.03125, %v786_v42  ;;  %vm844_vm7 = vweird.f32 %v2559_v4 }
 0x17a   : > { %v850_v55 = vmul.f32 0.5, %v849_v45  ;;  %v839_v53 = vmul.f32 %v2559_v4, %v838_v23  ;;  %v1219_v22 = vadd.f32 %v2569_v47, %v1208_v14  ;;  %vm845_vm12 = vmor %vm843_vm10, %vm844_vm7  ;;  %v1198_v28 = vmul.f32 %v2485_v43, %v2498_v7  ;;  %v1038_v7 = vpop.f32.mrf.mxu1 }
 0x17b   : > { %v860_v44 = vmul.f32 0.5, %v859_v10  ;;  %v810_v18 = vsub.f32 %v794_v29, %v802_v49  ;;  %vm883_vm14 = vweird.f32 %v2550_v48  ;;  %v1183_v40 = vadd.f32 %v2434_v20, %v2475_v38  ;;  %v1103_v10 = vpop.f32.mrf.mxu2 }
 0x17c   : > { %v851_v61 = vsub.f32 1.5, %v850_v55  ;;  %v840_v13 = vmul.f32 0.5, %v839_v53  ;;  %1227 = vst.msk [vmem:[%s2588_s4] sm:$0xff] %vm473_vm0, %v1219_v22  ;;  %v1205_v63 = vsub.f32 %v2529_v12, %v1197_v0  ;;  %vm893_vm2 = vweird.f32 %v2557_v26 }
 0x17d   : > { %v1621_v3 = vpop.eup %1620  ;;  %v861_v37 = vsub.f32 1.5, %v860_v44  ;;  %v818_v60 = vmax.f32 %v810_v18, 0.0  ;;  %vm873_vm5 = vweird.f32 %v2591_v24 }
 0x17e   : > { %v852_v39 = vmul.f32 %v2544_v41, %v851_v61  ;;  %v841_v11 = vsub.f32 1.5, %v840_v13  ;;  %v878_v16 = vmul.f32 %v1621_v3, %v2550_v48  ;;  %v1623_v9 = vpop.eup %1622  ;;  %vm884_vm13 = vweird.f32 %v1621_v3  ;;  %v1176_v61 = vpop.f32.mrf.mxu3 }
 0x17f   : > { %v862_v50 = vmul.f32 %v2552_v17, %v861_v37  ;;  %v888_v51 = vmul.f32 %v1623_v9, %v2557_v26  ;;  %v1625_v33 = vpop.eup %1624  ;;  %vm894_vm15 = vweird.f32 %v1623_v9  ;;  %vm885_vm1 = vmor %vm883_vm14, %vm884_vm13  ;;  %v1196_v48 = vmul.f32 %v2485_v43, %v2491_v21 }
 0x180   : > { %v856_v35 = vsel %vm855_vm8, %v2544_v41, %v852_v39  ;;  %v842_v30 = vmul.f32 %v2559_v4, %v841_v11  ;;  %v879_v1 = vmul.f32 %v1621_v3, %v878_v16  ;;  %v868_v8 = vmul.f32 %v1625_v33, %v2591_v24  ;;  %vm895_vm3 = vmor %vm893_vm2, %vm894_vm15 }
 0x181   : > { %v1210_v19 = vmul.f32 %v1202_v27, %v856_v35  ;;  %v866_v34 = vsel %vm865_vm11, %v2552_v17, %v862_v50  ;;  %v889_v2 = vmul.f32 %v1623_v9, %v888_v51  ;;  %v826_v17 = vadd.f32 1e-05, %v818_v60 }
 0x182   : > { %v1211_v32 = vmul.f32 %v1203_v62, %v866_v34  ;;  %v846_v36 = vsel %vm845_vm12, %v2559_v4, %v842_v30  ;;  %v880_v31 = vmul.f32 0.5, %v879_v1  ;;  %v869_v58 = vmul.f32 %v1625_v33, %v868_v8 }
 0x183   : > { %v1221_v57 = vadd.f32 %v2569_v47, %v1210_v19  ;;  %v1209_v46 = vmul.f32 %v1201_v25, %v846_v36  ;;  %v890_v6 = vmul.f32 0.5, %v889_v2  ;;  %1626 = vrsqrt.f32 %v826_v17  ;;  %v973_v25 = vpop.f32.mrf.mxu0 }
 0x184   : > { %v1222_v41 = vadd.f32 %v2569_v47, %v1211_v32  ;;  %v881_v5 = vsub.f32 1.5, %v880_v31  ;;  %v870_v52 = vmul.f32 0.5, %v869_v58  ;;  %v1206_v27 = vsub.f32 %v2531_v56, %v1198_v28 }
 0x185   : > { %1229 = vst.msk [vmem:[%s2588_s4 + $0x10] sm:$0xff] %vm473_vm0, %v1221_v57  ;;  %v1220_v59 = vadd.f32 %v2569_v47, %v1209_v46  ;;  %v891_v54 = vsub.f32 1.5, %v890_v6  ;;  %vm874_vm4 = vweird.f32 %v1625_v33  ;;  %v1039_v12 = vadd.f32 %v1038_v7, %v973_v25 }
 0x186   : > { %1230 = vst.msk [vmem:[%s2588_s4 + $0x18] sm:$0xff] %vm473_vm0, %v1222_v41  ;;  %v882_v4 = vmul.f32 %v1621_v3, %v881_v5  ;;  %v871_v38 = vsub.f32 1.5, %v870_v52  ;;  %v1204_v26 = vsub.f32 %v1183_v40, %v1196_v48  ;;  %vm875_vm6 = vmor %vm873_vm5, %vm874_vm4  ;;  %v1199_v37 = vmul.f32 %v2485_v43, %v2563_v15 }
 0x187   : > { %1228 = vst.msk [vmem:[%s2588_s4 + $0x8] sm:$0xff] %vm473_vm0, %v1220_v59  ;;  %v892_v23 = vmul.f32 %v1623_v9, %v891_v54  ;;  %v1113_v22 = vadd.f32 %v1103_v10, %v1039_v12  ;;  %vm903_vm8 = vweird.f32 %v826_v17 }
 0x188   : > { %v886_v45 = vsel %vm885_vm1, %v1621_v3, %v882_v4  ;;  %v872_v21 = vmul.f32 %v1625_v33, %v871_v38 }
 0x189   : > { %v1213_v20 = vmul.f32 %v1205_v63, %v886_v45  ;;  %v896_v14 = vsel %vm895_vm3, %v1623_v9, %v892_v23  ;;  %v1627_v42 = vpop.eup %1626  ;;  %v1186_v29 = vadd.f32 %v1176_v61, %v1113_v22 }
 0x18a   : > { %v1214_v53 = vmul.f32 %v1206_v27, %v896_v14  ;;  %v876_v62 = vsel %vm875_vm6, %v1625_v33, %v872_v21  ;;  %v898_v49 = vmul.f32 %v1627_v42, %v826_v17  ;;  %vm904_vm7 = vweird.f32 %v1627_v42 }
 0x18b   : > { %v1224_v55 = vadd.f32 %v2569_v47, %v1213_v20  ;;  %v1212_v44 = vmul.f32 %v1204_v26, %v876_v62  ;;  %v1207_v16 = vsub.f32 %v1186_v29, %v1199_v37  ;;  %vm905_vm9 = vmor %vm903_vm8, %vm904_vm7 }
 0x18c   : > { %v1225_v56 = vadd.f32 %v2569_v47, %v1214_v53  ;;  %v899_v13 = vmul.f32 %v1627_v42, %v898_v49 }
 0x18d   : > { %1232 = vst.msk [vmem:[%s2588_s4 + $0x28] sm:$0xff] %vm473_vm0, %v1224_v55  ;;  %v1223_v3 = vadd.f32 %v2569_v47, %v1212_v44 }
 0x18e   : > { %1233 = vst.msk [vmem:[%s2588_s4 + $0x30] sm:$0xff] %vm473_vm0, %v1225_v56  ;;  %v900_v24 = vmul.f32 0.5, %v899_v13 }
 0x18f   : > { %1231 = vst.msk [vmem:[%s2588_s4 + $0x20] sm:$0xff] %vm473_vm0, %v1223_v3 }
 0x190   : > { %v901_v39 = vsub.f32 1.5, %v900_v24 }
 0x192   : > { %v902_v11 = vmul.f32 %v1627_v42, %v901_v39 }
 0x194   : > { %v906_v9 = vsel %vm905_vm9, %v1627_v42, %v902_v11 }
 0x195   : > { %v1215_v50 = vmul.f32 %v1207_v16, %v906_v9 }
 0x197   : > { %v1226_v18 = vadd.f32 %v2569_v47, %v1215_v50 }
 0x199   : > { %1234 = vst.msk [vmem:[%s2588_s4 + $0x38] sm:$0xff] %vm473_vm0, %v1226_v18 }
 0x19a PF: > { %s22_s28 = sadd.s32 1, %s1850_s28   ;;  %s2746_s24 = sld [smem:[#allocation13_spill]] }
 0x19b   : > { %p19_p13 = scmp.ge.s32.totalorder %s22_s28, 8   ;;  %s2747_s23 = sld [smem:[#allocation20_spill]] }
 0x19c   : > { %s2748_s25 = sld [smem:[#allocation16_spill]]  ;;  %s2752_s18 = smov %s1814_s19 }
 0x19d   : > { %s2749_s7 = sld [smem:[#allocation17_spill]]  ;;  %s2753_s19 = smov %s1818_s20 }
 0x19e   : > { %s2750_s26 = sld [smem:[#allocation18_spill]]  ;;  %s2754_s20 = smov %s2042_s2 }
 0x19f   : > { %s2751_s27 = sld [smem:[#allocation19_spill]]  ;;  %s2755_s21 = smov %s1826_s22 }
 0x1a0   : > { %s2756_s22 = smov %s2746_s24  ;;  %21 = sbr.rel (!%p19_p13) target bundleno = 16 (0x10), region = 103 }
 0x1a2   : > { %s2757_s24 = smov %s2748_s25 }
 0x1a3   : > { %s2758_s25 = smov %s2749_s7 }
 0x1a5   :  { %1273 = vsyncpa [#allocation3], 1 }
 0x1a6   :  { %1275 = vsyncpa [#allocation3 + $0x1], 1 }
 0x1a7   :  { %1276 = vsyncpa [#allocation5], 1 }
 0x1a8   :  { %1278 = vsyncpa [#allocation5 + $0x1], 1 }
 0x1a9   :  { %1279 = vsyncpa [#allocation8], 1 }

</bundles_post_ra>
